<compile_context>
chip_gen: v7x
topology: tpu7x:2x2x1
jax: 0.10.0
libtpu: 0.0.40
codegen_flags: <defaults>
</compile_context>

<pallas_src>
import functools

import jax
import jax.numpy as jnp
from jax.experimental import pallas as pl
from jax.experimental.pallas import tpu as pltpu


def _block_kernel(x_ref, g1_ref, b1_ref, wqkv_ref, wproj_ref, bproj_ref,
                  g2_ref, b2_ref, wfc1_ref, bfc1_ref, wfc2_ref, bfc2_ref,
                  o_ref, *, n_head, head_size, eps):
    mxu_dtype = wqkv_ref.dtype                    # bf16 (or f32 for checking)
    Bb, T, C = x_ref.shape
    R = Bb * T                                    # rows per grid step (M dim)

    # (Bb, T, C) -> (R, C): merge of leading dims, layout-free.
    x_f32 = x_ref[...].reshape(R, C).astype(jnp.float32)

    # ---------------- LayerNorm 1 (f32 math, VPU) ----------------
    mean1 = jnp.mean(x_f32, axis=-1, keepdims=True)
    xc1 = x_f32 - mean1
    var1 = jnp.mean(xc1 * xc1, axis=-1, keepdims=True)
    ln1 = xc1 * jax.lax.rsqrt(var1 + eps)
    ln1 = (ln1 * g1_ref[0] + b1_ref[0]).astype(mxu_dtype)

    # ------------- fused QKV projection, all heads, all rows -------------
    qkv = jnp.dot(ln1, wqkv_ref[...],
                  preferred_element_type=jnp.float32)         # (R, 3C) f32

    scale = jnp.float32(head_size ** -0.5)
    row = jax.lax.broadcasted_iota(jnp.int32, (T, T), 0)
    col = jax.lax.broadcasted_iota(jnp.int32, (T, T), 1)
    causal = (col <= row)[None]                   # (1, T, T), hoisted
    neg_big = jnp.float32(-1e30)                  # finite, NaN-safe mask

    # ---- per-head attention, batched over the Bb sequences in this block ----
    sa = None                                     # f32 accumulator (R, C)
    for h in range(n_head):                       # short static loop
        lo = h * head_size
        qh = qkv[:, lo:lo + head_size].astype(mxu_dtype).reshape(Bb, T, head_size)
        kh = qkv[:, C + lo:C + lo + head_size].astype(mxu_dtype).reshape(Bb, T, head_size)
        vh = qkv[:, 2 * C + lo:2 * C + lo + head_size].astype(mxu_dtype).reshape(Bb, T, head_size)

        s = jnp.einsum('bqd,bkd->bqk', qh, kh,
                       preferred_element_type=jnp.float32) * scale
        s = jnp.where(causal, s, neg_big)
        s = s - jnp.max(s, axis=-1, keepdims=True)
        p = jnp.exp(s)
        p = p * pl.reciprocal(jnp.sum(p, axis=-1, keepdims=True), approx=True)
        # attention dropout: identity at inference
        oh = jnp.einsum('bqk,bkd->bqd', p.astype(mxu_dtype), vh,
                        preferred_element_type=jnp.float32)   # (Bb, T, hs)

        # Fold this head's output straight into the output projection:
        # no jnp.concatenate, output stays lane-dense (N = C).
        part = jnp.dot(oh.reshape(R, head_size).astype(mxu_dtype),
                       wproj_ref[lo:lo + head_size, :],
                       preferred_element_type=jnp.float32)    # (R, C)
        sa = part if sa is None else sa + part

    # ---------------- residual 1 ----------------
    x1 = x_f32 + sa + bproj_ref[0]

    # ---------------- LayerNorm 2 ----------------
    mean2 = jnp.mean(x1, axis=-1, keepdims=True)
    xc2 = x1 - mean2
    var2 = jnp.mean(xc2 * xc2, axis=-1, keepdims=True)
    ln2 = xc2 * jax.lax.rsqrt(var2 + eps)
    ln2 = (ln2 * g2_ref[0] + b2_ref[0]).astype(mxu_dtype)

    # ---------------- FeedForward (Linear -> ReLU -> Linear) ----------------
    h1 = jnp.dot(ln2, wfc1_ref[...], preferred_element_type=jnp.float32)
    h1 = jnp.maximum(h1 + bfc1_ref[0], jnp.float32(0))
    ffn = jnp.dot(h1.astype(mxu_dtype), wfc2_ref[...],
                  preferred_element_type=jnp.float32)
    ffn = ffn + bfc2_ref[0]

    # residual 2 + lane-dense store (last dim = C)
    o_ref[...] = (x1 + ffn).reshape(Bb, T, C).astype(o_ref.dtype)


def _pick_batch_block(B, T, max_rows=512):
    """Largest batch block that keeps >= 2 grid steps (v7x: 2 TensorCores)
    and <= max_rows rows per step. Ideally B_blk*T is a multiple of 256
    (v6e/v7x MXU tile) — not reachable at toy sizes."""
    best = 1
    for bb in range(1, B + 1):
        if B % bb:
            continue
        if bb * T > max_rows:
            continue
        if B >= 2 and B // bb < 2:
            continue
        best = bb
    return best


def block_forward(x, g1, b1, w_qkv, w_proj, b_proj, g2, b2,
                  w_fc1, b_fc1, w_fc2, b_fc2, *, n_head, eps=1e-5,
                  mxu_dtype=jnp.bfloat16):
    """x: (B, T, C). Weights are (in, out). Returns (B, T, C) in x.dtype."""
    B, T, C = x.shape
    head_size = C // n_head
    H3 = w_qkv.shape[1]
    Hf = w_fc1.shape[1]
    Bb = _pick_batch_block(B, T)
    grid = (B // Bb,)

    f32 = jnp.float32
    # Vectors stay f32 (VPU adds), 2-D (1, N) so they map onto VMEM tiles.
    g1r, b1r = g1.reshape(1, C).astype(f32), b1.reshape(1, C).astype(f32)
    g2r, b2r = g2.reshape(1, C).astype(f32), b2.reshape(1, C).astype(f32)
    bpr = b_proj.reshape(1, C).astype(f32)
    bfc1r = b_fc1.reshape(1, Hf).astype(f32)
    bfc2r = b_fc2.reshape(1, C).astype(f32)
    # MXU operands (weights) in bf16 (or f32 for the checking path).
    wqkv = w_qkv.astype(mxu_dtype)
    wproj = w_proj.astype(mxu_dtype)
    wfc1 = w_fc1.astype(mxu_dtype)
    wfc2 = w_fc2.astype(mxu_dtype)

    kernel = functools.partial(_block_kernel, n_head=n_head,
                               head_size=head_size, eps=eps)

    def full(shape):
        # whole-array block, same block index every grid step -> resident
        return pl.BlockSpec(shape, lambda i: (0, 0))

    operands = (x, g1r, b1r, wqkv, wproj, bpr, g2r, b2r,
                wfc1, bfc1r, wfc2, bfc2r)

    # VMEM limit sized to actual residency (weights + double-buffered
    # activation blocks) plus generous headroom for in-kernel intermediates.
    resident = sum(int(a.size) * a.dtype.itemsize for a in operands[1:])
    act_bytes = Bb * T * C * x.dtype.itemsize
    vmem_limit = int(2 * (resident + 2 * act_bytes)) + (24 << 20)

    return pl.pallas_call(
        kernel,
        out_shape=jax.ShapeDtypeStruct((B, T, C), x.dtype),
        grid_spec=pltpu.PrefetchScalarGridSpec(
            num_scalar_prefetch=0,
            grid=grid,
            in_specs=[
                pl.BlockSpec((Bb, T, C), lambda i: (i, 0, 0)),   # x block
                full((1, C)), full((1, C)),                      # ln1 gamma/beta
                full((C, H3)),                                   # fused QKV W
                full((C, C)), full((1, C)),                      # proj W/b
                full((1, C)), full((1, C)),                      # ln2 gamma/beta
                full((C, Hf)), full((1, Hf)),                    # fc1 W/b
                full((Hf, C)), full((1, C)),                     # fc2 W/b
            ],
            out_specs=pl.BlockSpec((Bb, T, C), lambda i: (i, 0, 0)),
        ),
        compiler_params=pltpu.CompilerParams(
            dimension_semantics=("parallel",),
            vmem_limit_bytes=vmem_limit),
    )(*operands)


def block_reference(x, g1, b1, w_qkv, w_proj, b_proj, g2, b2,
                    w_fc1, b_fc1, w_fc2, b_fc2, *, n_head, eps=1e-5):
    """Plain-JAX f32 reference mirroring the PyTorch Block forward (eval)."""
    B, T, C = x.shape
    hs = C // n_head

    def ln(z, g, b):
        m = z.mean(-1, keepdims=True)
        v = ((z - m) ** 2).mean(-1, keepdims=True)
        return (z - m) * jax.lax.rsqrt(v + eps) * g + b

    h = ln(x, g1, b1)
    q = (h @ w_qkv[:, :C]).reshape(B, T, n_head, hs)
    k = (h @ w_qkv[:, C:2 * C]).reshape(B, T, n_head, hs)
    v = (h @ w_qkv[:, 2 * C:]).reshape(B, T, n_head, hs)
    wei = jnp.einsum("bthd,bshd->bhts", q, k) * (hs ** -0.5)
    mask = jnp.tril(jnp.ones((T, T), dtype=bool))
    wei = jnp.where(mask[None, None], wei, -jnp.inf)
    p = jax.nn.softmax(wei, axis=-1)
    attn = jnp.einsum("bhts,bshd->bthd", p, v).reshape(B, T, C)
    x = x + attn @ w_proj + b_proj
    h2 = ln(x, g2, b2)
    ffn = jnp.maximum(h2 @ w_fc1 + b_fc1, 0.0) @ w_fc2 + b_fc2
    return x + ffn


if __name__ == "__main__":
    # hyps: block_size (= T) = 8, dropout irrelevant at inference.
    B, T = 8, 8                    # batch, sequence (block_size)
    n_embd, n_head = 128, 4        # lane-dense embedding, 4 heads of 32
    C = n_embd

    key = jax.random.PRNGKey(0)
    ks = jax.random.split(key, 14)
    x = jax.random.normal(ks[0], (B, T, C), dtype=jnp.float32)

    sc = C ** -0.5
    wq = jax.random.normal(ks[1], (C, C), jnp.float32) * sc
    wk = jax.random.normal(ks[2], (C, C), jnp.float32) * sc
    wv = jax.random.normal(ks[3], (C, C), jnp.float32) * sc
    w_qkv = jnp.concatenate([wq, wk, wv], axis=1)             # (C, 3C) fused
    w_proj = jax.random.normal(ks[4], (C, C), jnp.float32) * sc
    b_proj = jax.random.normal(ks[5], (C,), jnp.float32) * 0.02
    g1 = 1.0 + 0.1 * jax.random.normal(ks[6], (C,), jnp.float32)
    b1 = 0.1 * jax.random.normal(ks[7], (C,), jnp.float32)
    g2 = 1.0 + 0.1 * jax.random.normal(ks[8], (C,), jnp.float32)
    b2 = 0.1 * jax.random.normal(ks[9], (C,), jnp.float32)
    w_fc1 = jax.random.normal(ks[10], (C, 4 * C), jnp.float32) * sc
    b_fc1 = jax.random.normal(ks[11], (4 * C,), jnp.float32) * 0.02
    w_fc2 = jax.random.normal(ks[12], (4 * C, C), jnp.float32) * ((4 * C) ** -0.5)
    b_fc2 = jax.random.normal(ks[13], (C,), jnp.float32) * 0.02

    args = (x, g1, b1, w_qkv, w_proj, b_proj, g2, b2,
            w_fc1, b_fc1, w_fc2, b_fc2)

    # Tight correctness check: f32 MXU operands (only the approximate
    # softmax reciprocal differs from the exact reference).
    out_f32 = jax.block_until_ready(
        block_forward(*args, n_head=n_head, mxu_dtype=jnp.float32))
    # Performance configuration: bf16 MXU operands, f32 accumulation.
    out_bf16 = jax.block_until_ready(
        block_forward(*args, n_head=n_head, mxu_dtype=jnp.bfloat16))
    ref = block_reference(*args, n_head=n_head)

    assert out_f32.shape == (B, T, C) and out_bf16.shape == (B, T, C)
    err_f32 = float(jnp.max(jnp.abs(out_f32 - ref)))
    assert err_f32 < 2e-2, f"f32-path mismatch vs reference, max abs err = {err_f32}"
    rel_bf16 = float(jnp.max(jnp.abs(out_bf16 - ref) / (1.0 + jnp.abs(ref))))
    assert rel_bf16 < 5e-2, f"bf16-path mismatch vs reference, max rel err = {rel_bf16}"
    print("KERNEL_OK")
</pallas_src>

<mosaic_0001>
module attributes {stable_mosaic.version = 11 : i64} {
  func.func @_block_kernel(%arg0: i32, %arg1: memref<4x8x128xf32, #tpu.memory_space<vmem>>, %arg2: memref<1x128xf32, #tpu.memory_space<vmem>>, %arg3: memref<1x128xf32, #tpu.memory_space<vmem>>, %arg4: memref<128x384xf32, #tpu.memory_space<vmem>>, %arg5: memref<128x128xf32, #tpu.memory_space<vmem>>, %arg6: memref<1x128xf32, #tpu.memory_space<vmem>>, %arg7: memref<1x128xf32, #tpu.memory_space<vmem>>, %arg8: memref<1x128xf32, #tpu.memory_space<vmem>>, %arg9: memref<128x512xf32, #tpu.memory_space<vmem>>, %arg10: memref<1x512xf32, #tpu.memory_space<vmem>>, %arg11: memref<512x128xf32, #tpu.memory_space<vmem>>, %arg12: memref<1x128xf32, #tpu.memory_space<vmem>>, %arg13: memref<4x8x128xf32, #tpu.memory_space<vmem>>) attributes {dimension_semantics = [#tpu.dimension_semantics<parallel>], iteration_bounds = array<i64: 2>, scalar_prefetch = 0 : i64, scratch_operands = 0 : i64, tpu.core_type = #tpu.core_type<tc>, window_params = [{transform_indices = @transform_0, window_bounds = array<i64: 4, 8, 128>}, {pipeline_mode = #tpu.pipeline_mode<synchronous>, transform_indices = @transform_1, window_bounds = array<i64: 1, 128>}, {pipeline_mode = #tpu.pipeline_mode<synchronous>, transform_indices = @transform_2, window_bounds = array<i64: 1, 128>}, {pipeline_mode = #tpu.pipeline_mode<synchronous>, transform_indices = @transform_3, window_bounds = array<i64: 128, 384>}, {pipeline_mode = #tpu.pipeline_mode<synchronous>, transform_indices = @transform_4, window_bounds = array<i64: 128, 128>}, {pipeline_mode = #tpu.pipeline_mode<synchronous>, transform_indices = @transform_5, window_bounds = array<i64: 1, 128>}, {pipeline_mode = #tpu.pipeline_mode<synchronous>, transform_indices = @transform_6, window_bounds = array<i64: 1, 128>}, {pipeline_mode = #tpu.pipeline_mode<synchronous>, transform_indices = @transform_7, window_bounds = array<i64: 1, 128>}, {pipeline_mode = #tpu.pipeline_mode<synchronous>, transform_indices = @transform_8, window_bounds = array<i64: 128, 512>}, {pipeline_mode = #tpu.pipeline_mode<synchronous>, transform_indices = @transform_9, window_bounds = array<i64: 1, 512>}, {pipeline_mode = #tpu.pipeline_mode<synchronous>, transform_indices = @transform_10, window_bounds = array<i64: 512, 128>}, {pipeline_mode = #tpu.pipeline_mode<synchronous>, transform_indices = @transform_11, window_bounds = array<i64: 1, 128>}, {transform_indices = @transform_12, window_bounds = array<i64: 4, 8, 128>}]} {
    %c0 = arith.constant 0 : index
    %c0_0 = arith.constant 0 : index
    %c0_1 = arith.constant 0 : index
    %0 = vector.load %arg1[%c0, %c0_0, %c0_1] : memref<4x8x128xf32, #tpu.memory_space<vmem>>, vector<4x8x128xf32>
    %1 = vector.shape_cast %0 : vector<4x8x128xf32> to vector<32x128xf32>
    %cst = arith.constant dense<0.000000e+00> : vector<32xf32>
    %2 = vector.multi_reduction <add>, %1, %cst [1] : vector<32x128xf32> to vector<32xf32>
    %3 = vector.shape_cast %2 : vector<32xf32> to vector<32x1xf32>
    %cst_2 = arith.constant 1.280000e+02 : f32
    %4 = vector.broadcast %cst_2 : f32 to vector<32x1xf32>
    %5 = arith.divf %3, %4 : vector<32x1xf32>
    %6 = vector.broadcast %5 : vector<32x1xf32> to vector<32x128xf32>
    %7 = arith.subf %1, %6 : vector<32x128xf32>
    %8 = arith.mulf %7, %7 : vector<32x128xf32>
    %cst_3 = arith.constant dense<0.000000e+00> : vector<32xf32>
    %9 = vector.multi_reduction <add>, %8, %cst_3 [1] : vector<32x128xf32> to vector<32xf32>
    %10 = vector.shape_cast %9 : vector<32xf32> to vector<32x1xf32>
    %cst_4 = arith.constant 1.280000e+02 : f32
    %11 = vector.broadcast %cst_4 : f32 to vector<32x1xf32>
    %12 = arith.divf %10, %11 : vector<32x1xf32>
    %cst_5 = arith.constant 9.99999974E-6 : f32
    %13 = vector.broadcast %cst_5 : f32 to vector<32x1xf32>
    %14 = arith.addf %12, %13 : vector<32x1xf32>
    %15 = math.rsqrt %14 : vector<32x1xf32>
    %16 = vector.broadcast %15 : vector<32x1xf32> to vector<32x128xf32>
    %17 = arith.mulf %7, %16 : vector<32x128xf32>
    %c0_6 = arith.constant 0 : index
    %c0_7 = arith.constant 0 : index
    %18 = vector.load %arg2[%c0_6, %c0_7] : memref<1x128xf32, #tpu.memory_space<vmem>>, vector<1x128xf32>
    %19 = vector.shape_cast %18 : vector<1x128xf32> to vector<128xf32>
    %20 = vector.shape_cast %19 : vector<128xf32> to vector<1x128xf32>
    %21 = vector.broadcast %20 : vector<1x128xf32> to vector<32x128xf32>
    %22 = arith.mulf %17, %21 : vector<32x128xf32>
    %c0_8 = arith.constant 0 : index
    %c0_9 = arith.constant 0 : index
    %23 = vector.load %arg3[%c0_8, %c0_9] : memref<1x128xf32, #tpu.memory_space<vmem>>, vector<1x128xf32>
    %24 = vector.shape_cast %23 : vector<1x128xf32> to vector<128xf32>
    %25 = vector.shape_cast %24 : vector<128xf32> to vector<1x128xf32>
    %26 = vector.broadcast %25 : vector<1x128xf32> to vector<32x128xf32>
    %27 = arith.addf %22, %26 : vector<32x128xf32>
    %c0_10 = arith.constant 0 : index
    %c0_11 = arith.constant 0 : index
    %28 = vector.load %arg4[%c0_10, %c0_11] : memref<128x384xf32, #tpu.memory_space<vmem>>, vector<128x384xf32>
    %cst_12 = arith.constant dense<0.000000e+00> : vector<32x384xf32>
    %29 = tpu.matmul %27, %28, %cst_12 {dimension_numbers = #tpu.dot_dimension_numbers<[1], [0], [0], [1], [0, 0, 1, 1], [], []>} : vector<32x128xf32>, vector<128x384xf32>, vector<32x384xf32> -> vector<32x384xf32>
    %30 = tpu.iota {dimensions = array<i32: 0>} : vector<8x8xi32>
    %31 = tpu.iota {dimensions = array<i32: 1>} : vector<8x8xi32>
    %32 = arith.cmpi sle, %31, %30 : vector<8x8xi32>
    %33 = vector.shape_cast %32 : vector<8x8xi1> to vector<1x8x8xi1>
    %34 = vector.extract_strided_slice %29 {offsets = [0, 0], sizes = [32, 32], strides = [1, 1]} : vector<32x384xf32> to vector<32x32xf32>
    %35 = vector.shape_cast %34 : vector<32x32xf32> to vector<4x8x32xf32>
    %36 = vector.extract_strided_slice %29 {offsets = [0, 128], sizes = [32, 32], strides = [1, 1]} : vector<32x384xf32> to vector<32x32xf32>
    %37 = vector.shape_cast %36 : vector<32x32xf32> to vector<4x8x32xf32>
    %38 = vector.extract_strided_slice %29 {offsets = [0, 256], sizes = [32, 32], strides = [1, 1]} : vector<32x384xf32> to vector<32x32xf32>
    %39 = vector.shape_cast %38 : vector<32x32xf32> to vector<4x8x32xf32>
    "tpu.trace_start"() <{level = 10 : i32, message = "bqd,bkd->bqk"}> : () -> ()
    %cst_13 = arith.constant dense<0.000000e+00> : vector<4x8x8xf32>
    %40 = tpu.matmul %35, %37, %cst_13 {dimension_numbers = #tpu.dot_dimension_numbers<[2], [2], [1], [1], [0, 0, 0, 1, 1, 1], [0], [0]>} : vector<4x8x32xf32>, vector<4x8x32xf32>, vector<4x8x8xf32> -> vector<4x8x8xf32>
    "tpu.trace_stop"() : () -> ()
    %cst_14 = arith.constant 0.176776692 : f32
    %41 = vector.broadcast %cst_14 : f32 to vector<4x8x8xf32>
    %42 = arith.mulf %40, %41 : vector<4x8x8xf32>
    %cst_15 = arith.constant -1.000000e+30 : f32
    %43 = vector.shape_cast %33 : vector<1x8x8xi1> to vector<1x8x8xi1>
    %44 = vector.broadcast %43 : vector<1x8x8xi1> to vector<4x8x8xi1>
    %45 = vector.broadcast %cst_15 : f32 to vector<4x8x8xf32>
    %46 = arith.select %44, %42, %45 : vector<4x8x8xi1>, vector<4x8x8xf32>
    %cst_16 = arith.constant dense<0xFF800000> : vector<4x8xf32>
    %47 = vector.multi_reduction <maximumf>, %46, %cst_16 [2] : vector<4x8x8xf32> to vector<4x8xf32>
    %48 = vector.shape_cast %47 : vector<4x8xf32> to vector<4x8x1xf32>
    %49 = vector.broadcast %48 : vector<4x8x1xf32> to vector<4x8x8xf32>
    %50 = arith.subf %46, %49 : vector<4x8x8xf32>
    %51 = math.exp %50 : vector<4x8x8xf32>
    %cst_17 = arith.constant dense<0.000000e+00> : vector<4x8xf32>
    %52 = vector.multi_reduction <add>, %51, %cst_17 [2] : vector<4x8x8xf32> to vector<4x8xf32>
    %53 = vector.shape_cast %52 : vector<4x8xf32> to vector<4x8x1xf32>
    %54 = tpu.reciprocal %53 {approx = true} : vector<4x8x1xf32> -> vector<4x8x1xf32>
    %55 = vector.broadcast %54 : vector<4x8x1xf32> to vector<4x8x8xf32>
    %56 = arith.mulf %51, %55 : vector<4x8x8xf32>
    "tpu.trace_start"() <{level = 10 : i32, message = "bqk,bkd->bqd"}> : () -> ()
    %cst_18 = arith.constant dense<0.000000e+00> : vector<4x8x32xf32>
    %57 = tpu.matmul %56, %39, %cst_18 {dimension_numbers = #tpu.dot_dimension_numbers<[2], [1], [1], [2], [0, 0, 0, 1, 1, 2], [0], [0]>} : vector<4x8x8xf32>, vector<4x8x32xf32>, vector<4x8x32xf32> -> vector<4x8x32xf32>
    "tpu.trace_stop"() : () -> ()
    %58 = vector.shape_cast %57 : vector<4x8x32xf32> to vector<32x32xf32>
    %c0_19 = arith.constant 0 : index
    %c0_20 = arith.constant 0 : index
    %59 = vector.load %arg5[%c0_19, %c0_20] : memref<128x128xf32, #tpu.memory_space<vmem>>, vector<32x128xf32>
    %cst_21 = arith.constant dense<0.000000e+00> : vector<32x128xf32>
    %60 = tpu.matmul %58, %59, %cst_21 {dimension_numbers = #tpu.dot_dimension_numbers<[1], [0], [0], [1], [0, 0, 1, 1], [], []>} : vector<32x32xf32>, vector<32x128xf32>, vector<32x128xf32> -> vector<32x128xf32>
    %61 = vector.extract_strided_slice %29 {offsets = [0, 32], sizes = [32, 32], strides = [1, 1]} : vector<32x384xf32> to vector<32x32xf32>
    %62 = vector.shape_cast %61 : vector<32x32xf32> to vector<4x8x32xf32>
    %63 = vector.extract_strided_slice %29 {offsets = [0, 160], sizes = [32, 32], strides = [1, 1]} : vector<32x384xf32> to vector<32x32xf32>
    %64 = vector.shape_cast %63 : vector<32x32xf32> to vector<4x8x32xf32>
    %65 = vector.extract_strided_slice %29 {offsets = [0, 288], sizes = [32, 32], strides = [1, 1]} : vector<32x384xf32> to vector<32x32xf32>
    %66 = vector.shape_cast %65 : vector<32x32xf32> to vector<4x8x32xf32>
    "tpu.trace_start"() <{level = 10 : i32, message = "bqd,bkd->bqk"}> : () -> ()
    %cst_22 = arith.constant dense<0.000000e+00> : vector<4x8x8xf32>
    %67 = tpu.matmul %62, %64, %cst_22 {dimension_numbers = #tpu.dot_dimension_numbers<[2], [2], [1], [1], [0, 0, 0, 1, 1, 1], [0], [0]>} : vector<4x8x32xf32>, vector<4x8x32xf32>, vector<4x8x8xf32> -> vector<4x8x8xf32>
    "tpu.trace_stop"() : () -> ()
    %cst_23 = arith.constant 0.176776692 : f32
    %68 = vector.broadcast %cst_23 : f32 to vector<4x8x8xf32>
    %69 = arith.mulf %67, %68 : vector<4x8x8xf32>
    %cst_24 = arith.constant -1.000000e+30 : f32
    %70 = vector.shape_cast %33 : vector<1x8x8xi1> to vector<1x8x8xi1>
    %71 = vector.broadcast %70 : vector<1x8x8xi1> to vector<4x8x8xi1>
    %72 = vector.broadcast %cst_24 : f32 to vector<4x8x8xf32>
    %73 = arith.select %71, %69, %72 : vector<4x8x8xi1>, vector<4x8x8xf32>
    %cst_25 = arith.constant dense<0xFF800000> : vector<4x8xf32>
    %74 = vector.multi_reduction <maximumf>, %73, %cst_25 [2] : vector<4x8x8xf32> to vector<4x8xf32>
    %75 = vector.shape_cast %74 : vector<4x8xf32> to vector<4x8x1xf32>
    %76 = vector.broadcast %75 : vector<4x8x1xf32> to vector<4x8x8xf32>
    %77 = arith.subf %73, %76 : vector<4x8x8xf32>
    %78 = math.exp %77 : vector<4x8x8xf32>
    %cst_26 = arith.constant dense<0.000000e+00> : vector<4x8xf32>
    %79 = vector.multi_reduction <add>, %78, %cst_26 [2] : vector<4x8x8xf32> to vector<4x8xf32>
    %80 = vector.shape_cast %79 : vector<4x8xf32> to vector<4x8x1xf32>
    %81 = tpu.reciprocal %80 {approx = true} : vector<4x8x1xf32> -> vector<4x8x1xf32>
    %82 = vector.broadcast %81 : vector<4x8x1xf32> to vector<4x8x8xf32>
    %83 = arith.mulf %78, %82 : vector<4x8x8xf32>
    "tpu.trace_start"() <{level = 10 : i32, message = "bqk,bkd->bqd"}> : () -> ()
    %cst_27 = arith.constant dense<0.000000e+00> : vector<4x8x32xf32>
    %84 = tpu.matmul %83, %66, %cst_27 {dimension_numbers = #tpu.dot_dimension_numbers<[2], [1], [1], [2], [0, 0, 0, 1, 1, 2], [0], [0]>} : vector<4x8x8xf32>, vector<4x8x32xf32>, vector<4x8x32xf32> -> vector<4x8x32xf32>
    "tpu.trace_stop"() : () -> ()
    %85 = vector.shape_cast %84 : vector<4x8x32xf32> to vector<32x32xf32>
    %c32 = arith.constant 32 : index
    %c0_28 = arith.constant 0 : index
    %86 = vector.load %arg5[%c32, %c0_28] : memref<128x128xf32, #tpu.memory_space<vmem>>, vector<32x128xf32>
    %cst_29 = arith.constant dense<0.000000e+00> : vector<32x128xf32>
    %87 = tpu.matmul %85, %86, %cst_29 {dimension_numbers = #tpu.dot_dimension_numbers<[1], [0], [0], [1], [0, 0, 1, 1], [], []>} : vector<32x32xf32>, vector<32x128xf32>, vector<32x128xf32> -> vector<32x128xf32>
    %88 = arith.addf %60, %87 : vector<32x128xf32>
    %89 = vector.extract_strided_slice %29 {offsets = [0, 64], sizes = [32, 32], strides = [1, 1]} : vector<32x384xf32> to vector<32x32xf32>
    %90 = vector.shape_cast %89 : vector<32x32xf32> to vector<4x8x32xf32>
    %91 = vector.extract_strided_slice %29 {offsets = [0, 192], sizes = [32, 32], strides = [1, 1]} : vector<32x384xf32> to vector<32x32xf32>
    %92 = vector.shape_cast %91 : vector<32x32xf32> to vector<4x8x32xf32>
    %93 = vector.extract_strided_slice %29 {offsets = [0, 320], sizes = [32, 32], strides = [1, 1]} : vector<32x384xf32> to vector<32x32xf32>
    %94 = vector.shape_cast %93 : vector<32x32xf32> to vector<4x8x32xf32>
    "tpu.trace_start"() <{level = 10 : i32, message = "bqd,bkd->bqk"}> : () -> ()
    %cst_30 = arith.constant dense<0.000000e+00> : vector<4x8x8xf32>
    %95 = tpu.matmul %90, %92, %cst_30 {dimension_numbers = #tpu.dot_dimension_numbers<[2], [2], [1], [1], [0, 0, 0, 1, 1, 1], [0], [0]>} : vector<4x8x32xf32>, vector<4x8x32xf32>, vector<4x8x8xf32> -> vector<4x8x8xf32>
    "tpu.trace_stop"() : () -> ()
    %cst_31 = arith.constant 0.176776692 : f32
    %96 = vector.broadcast %cst_31 : f32 to vector<4x8x8xf32>
    %97 = arith.mulf %95, %96 : vector<4x8x8xf32>
    %cst_32 = arith.constant -1.000000e+30 : f32
    %98 = vector.shape_cast %33 : vector<1x8x8xi1> to vector<1x8x8xi1>
    %99 = vector.broadcast %98 : vector<1x8x8xi1> to vector<4x8x8xi1>
    %100 = vector.broadcast %cst_32 : f32 to vector<4x8x8xf32>
    %101 = arith.select %99, %97, %100 : vector<4x8x8xi1>, vector<4x8x8xf32>
    %cst_33 = arith.constant dense<0xFF800000> : vector<4x8xf32>
    %102 = vector.multi_reduction <maximumf>, %101, %cst_33 [2] : vector<4x8x8xf32> to vector<4x8xf32>
    %103 = vector.shape_cast %102 : vector<4x8xf32> to vector<4x8x1xf32>
    %104 = vector.broadcast %103 : vector<4x8x1xf32> to vector<4x8x8xf32>
    %105 = arith.subf %101, %104 : vector<4x8x8xf32>
    %106 = math.exp %105 : vector<4x8x8xf32>
    %cst_34 = arith.constant dense<0.000000e+00> : vector<4x8xf32>
    %107 = vector.multi_reduction <add>, %106, %cst_34 [2] : vector<4x8x8xf32> to vector<4x8xf32>
    %108 = vector.shape_cast %107 : vector<4x8xf32> to vector<4x8x1xf32>
    %109 = tpu.reciprocal %108 {approx = true} : vector<4x8x1xf32> -> vector<4x8x1xf32>
    %110 = vector.broadcast %109 : vector<4x8x1xf32> to vector<4x8x8xf32>
    %111 = arith.mulf %106, %110 : vector<4x8x8xf32>
    "tpu.trace_start"() <{level = 10 : i32, message = "bqk,bkd->bqd"}> : () -> ()
    %cst_35 = arith.constant dense<0.000000e+00> : vector<4x8x32xf32>
    %112 = tpu.matmul %111, %94, %cst_35 {dimension_numbers = #tpu.dot_dimension_numbers<[2], [1], [1], [2], [0, 0, 0, 1, 1, 2], [0], [0]>} : vector<4x8x8xf32>, vector<4x8x32xf32>, vector<4x8x32xf32> -> vector<4x8x32xf32>
    "tpu.trace_stop"() : () -> ()
    %113 = vector.shape_cast %112 : vector<4x8x32xf32> to vector<32x32xf32>
    %c64 = arith.constant 64 : index
    %c0_36 = arith.constant 0 : index
    %114 = vector.load %arg5[%c64, %c0_36] : memref<128x128xf32, #tpu.memory_space<vmem>>, vector<32x128xf32>
    %cst_37 = arith.constant dense<0.000000e+00> : vector<32x128xf32>
    %115 = tpu.matmul %113, %114, %cst_37 {dimension_numbers = #tpu.dot_dimension_numbers<[1], [0], [0], [1], [0, 0, 1, 1], [], []>} : vector<32x32xf32>, vector<32x128xf32>, vector<32x128xf32> -> vector<32x128xf32>
    %116 = arith.addf %88, %115 : vector<32x128xf32>
    %117 = vector.extract_strided_slice %29 {offsets = [0, 96], sizes = [32, 32], strides = [1, 1]} : vector<32x384xf32> to vector<32x32xf32>
    %118 = vector.shape_cast %117 : vector<32x32xf32> to vector<4x8x32xf32>
    %119 = vector.extract_strided_slice %29 {offsets = [0, 224], sizes = [32, 32], strides = [1, 1]} : vector<32x384xf32> to vector<32x32xf32>
    %120 = vector.shape_cast %119 : vector<32x32xf32> to vector<4x8x32xf32>
    %121 = vector.extract_strided_slice %29 {offsets = [0, 352], sizes = [32, 32], strides = [1, 1]} : vector<32x384xf32> to vector<32x32xf32>
    %122 = vector.shape_cast %121 : vector<32x32xf32> to vector<4x8x32xf32>
    "tpu.trace_start"() <{level = 10 : i32, message = "bqd,bkd->bqk"}> : () -> ()
    %cst_38 = arith.constant dense<0.000000e+00> : vector<4x8x8xf32>
    %123 = tpu.matmul %118, %120, %cst_38 {dimension_numbers = #tpu.dot_dimension_numbers<[2], [2], [1], [1], [0, 0, 0, 1, 1, 1], [0], [0]>} : vector<4x8x32xf32>, vector<4x8x32xf32>, vector<4x8x8xf32> -> vector<4x8x8xf32>
    "tpu.trace_stop"() : () -> ()
    %cst_39 = arith.constant 0.176776692 : f32
    %124 = vector.broadcast %cst_39 : f32 to vector<4x8x8xf32>
    %125 = arith.mulf %123, %124 : vector<4x8x8xf32>
    %cst_40 = arith.constant -1.000000e+30 : f32
    %126 = vector.shape_cast %33 : vector<1x8x8xi1> to vector<1x8x8xi1>
    %127 = vector.broadcast %126 : vector<1x8x8xi1> to vector<4x8x8xi1>
    %128 = vector.broadcast %cst_40 : f32 to vector<4x8x8xf32>
    %129 = arith.select %127, %125, %128 : vector<4x8x8xi1>, vector<4x8x8xf32>
    %cst_41 = arith.constant dense<0xFF800000> : vector<4x8xf32>
    %130 = vector.multi_reduction <maximumf>, %129, %cst_41 [2] : vector<4x8x8xf32> to vector<4x8xf32>
    %131 = vector.shape_cast %130 : vector<4x8xf32> to vector<4x8x1xf32>
    %132 = vector.broadcast %131 : vector<4x8x1xf32> to vector<4x8x8xf32>
    %133 = arith.subf %129, %132 : vector<4x8x8xf32>
    %134 = math.exp %133 : vector<4x8x8xf32>
    %cst_42 = arith.constant dense<0.000000e+00> : vector<4x8xf32>
    %135 = vector.multi_reduction <add>, %134, %cst_42 [2] : vector<4x8x8xf32> to vector<4x8xf32>
    %136 = vector.shape_cast %135 : vector<4x8xf32> to vector<4x8x1xf32>
    %137 = tpu.reciprocal %136 {approx = true} : vector<4x8x1xf32> -> vector<4x8x1xf32>
    %138 = vector.broadcast %137 : vector<4x8x1xf32> to vector<4x8x8xf32>
    %139 = arith.mulf %134, %138 : vector<4x8x8xf32>
    "tpu.trace_start"() <{level = 10 : i32, message = "bqk,bkd->bqd"}> : () -> ()
    %cst_43 = arith.constant dense<0.000000e+00> : vector<4x8x32xf32>
    %140 = tpu.matmul %139, %122, %cst_43 {dimension_numbers = #tpu.dot_dimension_numbers<[2], [1], [1], [2], [0, 0, 0, 1, 1, 2], [0], [0]>} : vector<4x8x8xf32>, vector<4x8x32xf32>, vector<4x8x32xf32> -> vector<4x8x32xf32>
    "tpu.trace_stop"() : () -> ()
    %141 = vector.shape_cast %140 : vector<4x8x32xf32> to vector<32x32xf32>
    %c96 = arith.constant 96 : index
    %c0_44 = arith.constant 0 : index
    %142 = vector.load %arg5[%c96, %c0_44] : memref<128x128xf32, #tpu.memory_space<vmem>>, vector<32x128xf32>
    %cst_45 = arith.constant dense<0.000000e+00> : vector<32x128xf32>
    %143 = tpu.matmul %141, %142, %cst_45 {dimension_numbers = #tpu.dot_dimension_numbers<[1], [0], [0], [1], [0, 0, 1, 1], [], []>} : vector<32x32xf32>, vector<32x128xf32>, vector<32x128xf32> -> vector<32x128xf32>
    %144 = arith.addf %116, %143 : vector<32x128xf32>
    %145 = arith.addf %1, %144 : vector<32x128xf32>
    %c0_46 = arith.constant 0 : index
    %c0_47 = arith.constant 0 : index
    %146 = vector.load %arg6[%c0_46, %c0_47] : memref<1x128xf32, #tpu.memory_space<vmem>>, vector<1x128xf32>
    %147 = vector.shape_cast %146 : vector<1x128xf32> to vector<128xf32>
    %148 = vector.shape_cast %147 : vector<128xf32> to vector<1x128xf32>
    %149 = vector.broadcast %148 : vector<1x128xf32> to vector<32x128xf32>
    %150 = arith.addf %145, %149 : vector<32x128xf32>
    %cst_48 = arith.constant dense<0.000000e+00> : vector<32xf32>
    %151 = vector.multi_reduction <add>, %150, %cst_48 [1] : vector<32x128xf32> to vector<32xf32>
    %152 = vector.shape_cast %151 : vector<32xf32> to vector<32x1xf32>
    %cst_49 = arith.constant 1.280000e+02 : f32
    %153 = vector.broadcast %cst_49 : f32 to vector<32x1xf32>
    %154 = arith.divf %152, %153 : vector<32x1xf32>
    %155 = vector.broadcast %154 : vector<32x1xf32> to vector<32x128xf32>
    %156 = arith.subf %150, %155 : vector<32x128xf32>
    %157 = arith.mulf %156, %156 : vector<32x128xf32>
    %cst_50 = arith.constant dense<0.000000e+00> : vector<32xf32>
    %158 = vector.multi_reduction <add>, %157, %cst_50 [1] : vector<32x128xf32> to vector<32xf32>
    %159 = vector.shape_cast %158 : vector<32xf32> to vector<32x1xf32>
    %cst_51 = arith.constant 1.280000e+02 : f32
    %160 = vector.broadcast %cst_51 : f32 to vector<32x1xf32>
    %161 = arith.divf %159, %160 : vector<32x1xf32>
    %cst_52 = arith.constant 9.99999974E-6 : f32
    %162 = vector.broadcast %cst_52 : f32 to vector<32x1xf32>
    %163 = arith.addf %161, %162 : vector<32x1xf32>
    %164 = math.rsqrt %163 : vector<32x1xf32>
    %165 = vector.broadcast %164 : vector<32x1xf32> to vector<32x128xf32>
    %166 = arith.mulf %156, %165 : vector<32x128xf32>
    %c0_53 = arith.constant 0 : index
    %c0_54 = arith.constant 0 : index
    %167 = vector.load %arg7[%c0_53, %c0_54] : memref<1x128xf32, #tpu.memory_space<vmem>>, vector<1x128xf32>
    %168 = vector.shape_cast %167 : vector<1x128xf32> to vector<128xf32>
    %169 = vector.shape_cast %168 : vector<128xf32> to vector<1x128xf32>
    %170 = vector.broadcast %169 : vector<1x128xf32> to vector<32x128xf32>
    %171 = arith.mulf %166, %170 : vector<32x128xf32>
    %c0_55 = arith.constant 0 : index
    %c0_56 = arith.constant 0 : index
    %172 = vector.load %arg8[%c0_55, %c0_56] : memref<1x128xf32, #tpu.memory_space<vmem>>, vector<1x128xf32>
    %173 = vector.shape_cast %172 : vector<1x128xf32> to vector<128xf32>
    %174 = vector.shape_cast %173 : vector<128xf32> to vector<1x128xf32>
    %175 = vector.broadcast %174 : vector<1x128xf32> to vector<32x128xf32>
    %176 = arith.addf %171, %175 : vector<32x128xf32>
    %c0_57 = arith.constant 0 : index
    %c0_58 = arith.constant 0 : index
    %177 = vector.load %arg9[%c0_57, %c0_58] : memref<128x512xf32, #tpu.memory_space<vmem>>, vector<128x512xf32>
    %cst_59 = arith.constant dense<0.000000e+00> : vector<32x512xf32>
    %178 = tpu.matmul %176, %177, %cst_59 {dimension_numbers = #tpu.dot_dimension_numbers<[1], [0], [0], [1], [0, 0, 1, 1], [], []>} : vector<32x128xf32>, vector<128x512xf32>, vector<32x512xf32> -> vector<32x512xf32>
    %c0_60 = arith.constant 0 : index
    %c0_61 = arith.constant 0 : index
    %179 = vector.load %arg10[%c0_60, %c0_61] : memref<1x512xf32, #tpu.memory_space<vmem>>, vector<1x512xf32>
    %180 = vector.shape_cast %179 : vector<1x512xf32> to vector<512xf32>
    %181 = vector.shape_cast %180 : vector<512xf32> to vector<1x512xf32>
    %182 = vector.broadcast %181 : vector<1x512xf32> to vector<32x512xf32>
    %183 = arith.addf %178, %182 : vector<32x512xf32>
    %cst_62 = arith.constant 0.000000e+00 : f32
    %184 = vector.broadcast %cst_62 : f32 to vector<32x512xf32>
    %185 = arith.maximumf %183, %184 : vector<32x512xf32>
    %c0_63 = arith.constant 0 : index
    %c0_64 = arith.constant 0 : index
    %186 = vector.load %arg11[%c0_63, %c0_64] : memref<512x128xf32, #tpu.memory_space<vmem>>, vector<512x128xf32>
    %cst_65 = arith.constant dense<0.000000e+00> : vector<32x128xf32>
    %187 = tpu.matmul %185, %186, %cst_65 {dimension_numbers = #tpu.dot_dimension_numbers<[1], [0], [0], [1], [0, 0, 1, 1], [], []>} : vector<32x512xf32>, vector<512x128xf32>, vector<32x128xf32> -> vector<32x128xf32>
    %c0_66 = arith.constant 0 : index
    %c0_67 = arith.constant 0 : index
    %188 = vector.load %arg12[%c0_66, %c0_67] : memref<1x128xf32, #tpu.memory_space<vmem>>, vector<1x128xf32>
    %189 = vector.shape_cast %188 : vector<1x128xf32> to vector<128xf32>
    %190 = vector.shape_cast %189 : vector<128xf32> to vector<1x128xf32>
    %191 = vector.broadcast %190 : vector<1x128xf32> to vector<32x128xf32>
    %192 = arith.addf %187, %191 : vector<32x128xf32>
    %193 = arith.addf %150, %192 : vector<32x128xf32>
    %194 = vector.shape_cast %193 : vector<32x128xf32> to vector<4x8x128xf32>
    %c0_68 = arith.constant 0 : index
    %c0_69 = arith.constant 0 : index
    %c0_70 = arith.constant 0 : index
    %195 = vector.load %arg13[%c0_68, %c0_69, %c0_70] : memref<4x8x128xf32, #tpu.memory_space<vmem>>, vector<4x8x128xf32>
    tpu.vector_store %arg13[%c0_68, %c0_69, %c0_70], %194 {strides = array<i32>} : memref<4x8x128xf32, #tpu.memory_space<vmem>>, vector<4x8x128xf32>,
    return
  }
  func.func @transform_0(%arg0: i32) -> (i32, i32, i32) {
    %c0_i32 = arith.constant 0 : i32
    %c0_i32_0 = arith.constant 0 : i32
    %c0_i32_1 = arith.constant 0 : i32
    return %arg0, %c0_i32, %c0_i32_0 : i32, i32, i32
  }
  func.func @transform_1(%arg0: i32) -> (i32, i32) {
    %c0_i32 = arith.constant 0 : i32
    %c0_i32_0 = arith.constant 0 : i32
    %c0_i32_1 = arith.constant 0 : i32
    return %c0_i32, %c0_i32_0 : i32, i32
  }
  func.func @transform_2(%arg0: i32) -> (i32, i32) {
    %c0_i32 = arith.constant 0 : i32
    %c0_i32_0 = arith.constant 0 : i32
    %c0_i32_1 = arith.constant 0 : i32
    return %c0_i32, %c0_i32_0 : i32, i32
  }
  func.func @transform_3(%arg0: i32) -> (i32, i32) {
    %c0_i32 = arith.constant 0 : i32
    %c0_i32_0 = arith.constant 0 : i32
    %c0_i32_1 = arith.constant 0 : i32
    return %c0_i32, %c0_i32_0 : i32, i32
  }
  func.func @transform_4(%arg0: i32) -> (i32, i32) {
    %c0_i32 = arith.constant 0 : i32
    %c0_i32_0 = arith.constant 0 : i32
    %c0_i32_1 = arith.constant 0 : i32
    return %c0_i32, %c0_i32_0 : i32, i32
  }
  func.func @transform_5(%arg0: i32) -> (i32, i32) {
    %c0_i32 = arith.constant 0 : i32
    %c0_i32_0 = arith.constant 0 : i32
    %c0_i32_1 = arith.constant 0 : i32
    return %c0_i32, %c0_i32_0 : i32, i32
  }
  func.func @transform_6(%arg0: i32) -> (i32, i32) {
    %c0_i32 = arith.constant 0 : i32
    %c0_i32_0 = arith.constant 0 : i32
    %c0_i32_1 = arith.constant 0 : i32
    return %c0_i32, %c0_i32_0 : i32, i32
  }
  func.func @transform_7(%arg0: i32) -> (i32, i32) {
    %c0_i32 = arith.constant 0 : i32
    %c0_i32_0 = arith.constant 0 : i32
    %c0_i32_1 = arith.constant 0 : i32
    return %c0_i32, %c0_i32_0 : i32, i32
  }
  func.func @transform_8(%arg0: i32) -> (i32, i32) {
    %c0_i32 = arith.constant 0 : i32
    %c0_i32_0 = arith.constant 0 : i32
    %c0_i32_1 = arith.constant 0 : i32
    return %c0_i32, %c0_i32_0 : i32, i32
  }
  func.func @transform_9(%arg0: i32) -> (i32, i32) {
    %c0_i32 = arith.constant 0 : i32
    %c0_i32_0 = arith.constant 0 : i32
    %c0_i32_1 = arith.constant 0 : i32
    return %c0_i32, %c0_i32_0 : i32, i32
  }
  func.func @transform_10(%arg0: i32) -> (i32, i32) {
    %c0_i32 = arith.constant 0 : i32
    %c0_i32_0 = arith.constant 0 : i32
    %c0_i32_1 = arith.constant 0 : i32
    return %c0_i32, %c0_i32_0 : i32, i32
  }
  func.func @transform_11(%arg0: i32) -> (i32, i32) {
    %c0_i32 = arith.constant 0 : i32
    %c0_i32_0 = arith.constant 0 : i32
    %c0_i32_1 = arith.constant 0 : i32
    return %c0_i32, %c0_i32_0 : i32, i32
  }
  func.func @transform_12(%arg0: i32) -> (i32, i32, i32) {
    %c0_i32 = arith.constant 0 : i32
    %c0_i32_0 = arith.constant 0 : i32
    %c0_i32_1 = arith.constant 0 : i32
    return %arg0, %c0_i32, %c0_i32_0 : i32, i32, i32
  }
}

</mosaic_0001>

<bundles_post_ra>
// kernel: tpu_custom_call.1
= control target key start
LH: loop header
LB: loop body
LE: loop exit
PB: predicated region body
PF: predicated region fallthrough
CT: control target
= control target key end

     0   :  { %s6644_s0 = inlined_call_operand.hbm [shape: f32[8,8,128], index: 0, kind: input, shape index: {}]   ;;  %s6645_s1 = inlined_call_operand.vmem [shape: f32[1,128], index: 1, kind: input, shape index: {}]   ;;  %s6646_s2 = inlined_call_operand.vmem [shape: f32[1,128], index: 2, kind: input, shape index: {}]   ;;  %s6647_s3 = inlined_call_operand.hbm [shape: f32[128,384], index: 3, kind: input, shape index: {}]   ;;  %s6648_s4 = inlined_call_operand.hbm [shape: f32[128,128], index: 4, kind: input, shape index: {}]   ;;  %s6649_s5 = inlined_call_operand.vmem [shape: f32[1,128], index: 5, kind: input, shape index: {}]   ;;  %s6650_s6 = inlined_call_operand.vmem [shape: f32[1,128], index: 6, kind: input, shape index: {}]   ;;  %s6651_s7 = inlined_call_operand.vmem [shape: f32[1,128], index: 7, kind: input, shape index: {}]   ;;  %s6652_s8 = inlined_call_operand.hbm [shape: f32[128,512], index: 8, kind: input, shape index: {}]   ;;  %s6653_s9 = inlined_call_operand.vmem [shape: f32[1,512], index: 9, kind: input, shape index: {}]   ;;  %s6654_s10 = inlined_call_operand.hbm [shape: f32[512,128], index: 10, kind: input, shape index: {}]   ;;  %s6655_s11 = inlined_call_operand.vmem [shape: f32[1,128], index: 11, kind: input, shape index: {}]   ;;  %s6656_s12 = inlined_call_operand.hbm [shape: f32[8,8,128], index: 12, kind: output, shape index: {}]  }
   0x1   :  { %6663 = sst [smem:[#allocation18_spill]] %s6647_s3 }
   0x2   :  { %6664 = sst [smem:[#allocation19_spill]] %s6653_s9 }
   0x3   :  { %6665 = sst [smem:[#allocation20_spill]] %s6655_s11 }
   0x4   :  { %6666 = sst [smem:[#allocation21_spill]] %s6656_s12 }
   0x5   :  { %17 = vsyncpa [#allocation3], 0 }
   0x6   :  { %19 = vsyncpa [#allocation3 + $0x1], 0 }
   0x7   :  { %20 = vsyncpa [#allocation6], 0 }
   0x8   :  { %21 = vsyncpa [#allocation9], 0 }
   0x9   :  { %22 = vsyncpa [#allocation4], 0 }
   0xa   :  { %24 = vsyncpa [#allocation4 + $0x1], 0  ;;  %s5871_s21 = smov 0   ;;  %s5873_s22 = smov 0  }
   0xb   :  { %s5875_s23 = smov 0   ;;  %s5877_s24 = smov 0  }
   0xc LB: > { %6667 = sst [smem:[#allocation16_spill]] %s5773_s21  ;;  %s5892_s25 = sadd.s32 4294967295, %s5785_s24   ;;  %s5785_s24 = sphi %s5877_s24, %s6696_s24   ;;  %s5781_s23 = sphi %s5875_s23, %s6695_s23   ;;  %s5777_s22 = sphi %s5873_s22, %s6694_s22   ;;  %s5773_s21 = sphi %s5871_s21, %s6693_s21  }
   0xd   : > { %s4597_s26 = sadd.s32 4294967294, %s5785_s24   ;;  %p50_p0 = scmp.ne.s32.totalorder %s5777_s22, %s5773_s21 }
   0xe   : > { %p6658_p1 = scmp.eq.s32.totalorder %s5892_s25, 0  ;;  %p311_p3 = scmp.eq.s32.totalorder %s4597_s26, 1 }
   0xf   : > { %p4598_p5 = scmp.ge.s32.totalorder %s5785_s24, 1  ;;  %p318_p7 = scmp.lt.s32.totalorder %s5785_s24, 3 }
  0x10   : > { %p5901_p4 = por %p6658_p1, %p50_p0  ;;  %p5906_p6 = por %p311_p3, %p50_p0 }
  0x11   : > { %p5911_p8 = pnand %p4598_p5, %p318_p7  ;;  %s5787_s30 = smov [#allocation5]  }
  0x12   : > { %s6668_s27 = scalar_select %p5901_p4, 1, 0 }
  0x13   : > { %s6669_s28 = scalar_select %p5906_p6, 1, 0 }
  0x14   : > { %s6671_s29 = scalar_select %p5911_p8, 1, 0 }
  0x15   : > { %6670 = sst [smem:[#allocation17_spill]] %s6669_s28  ;;  %s336_s13 = sshll.u32 %s5787_s30, 4  ;;  %s5915_s13 = int_to_ptr.vmem [resolvable:$true] %s336_s13 }
  0x16   : > { %p5405_p9 = pneg %p5911_p8  ;;  %s5788_s15 = smov [#allocation8]  }
  0x17   : > { %s371_s16 = sshll.u32 %s5788_s15, 4  ;;  %s6673_s3 = sld [smem:[#allocation18_spill]]  ;;  %s5926_s16 = int_to_ptr.vmem [resolvable:$true] %s371_s16 }
  0x18   : > { %p5922_p11 = pnand %p5405_p9, %p6658_p1 }
  0x1a   : > { %p5936_p13 = pneg %p5922_p11 }
  0x1d   : > { %s5569_s19 = scalar_lea.hbm %s6673_s3, 6144 }
  0x1e   : > { %p5570_p12 = scmp.ne.s32.totalorder %s6673_s3, %s5569_s19  ;;  %p5576_p5 = scmp.lt.u32.totalorder %s5569_s19, %s6673_s3 }
  0x20   : > { %p5572_p0 = pnand %p5936_p13, %p5570_p12 }
  0x22   : > { %p5573_p3 = pneg %p5572_p0 }
  0x24   : > { %p5578_p7 = pnand %p5576_p5, %p5573_p3 }
  0x26   : > { %5581 = shalt.err (!%p5578_p7)
}
  0x27   : > { %s5582_s17 = scalar_lea.vmem %s5915_s13, 6144  ;;  %p5590_p2 = scmp.lt.s32.totalorder %s5915_s13, %s5915_s13 }
  0x28   : > { %p5583_p9 = scmp.ne.s32.totalorder %s5915_s13, %s5582_s17  ;;  %p5591_p6 = scmp.lt.s32.totalorder %s5582_s17, %s5582_s17 }
  0x2a   : > { %p5585_p10 = pnand %p5583_p9, %p5936_p13  ;;  %p5592_p12 = por %p5591_p6, %p5590_p2 }
  0x2c   : > { %p5586_p1 = pneg %p5585_p10 }
  0x2e   : > { %p5593_p0 = pnand %p5592_p12, %p5586_p1 }
  0x30   : > { %5596 = shalt.err (!%p5593_p0)
}
  0x31   : > { %s5789_s18 = smov 384   ;;  %s5790_s28 = smov 24  }
  0x32   : > { %5408 = dma.hbm_to_vmem [thread:$0]  (!%p5922_p11), %s6673_s3, 6144, %s5915_s13, [#allocation6], %s5789_s18, %s5789_s18, %s5790_s28  }
  0x33   : > { %s5597_s21 = scalar_lea.hbm %s6652_s8, 8192 }
  0x34   : > { %p5598_p2 = scmp.ne.s32.totalorder %s6652_s8, %s5597_s21  ;;  %p5604_p10 = scmp.lt.u32.totalorder %s5597_s21, %s6652_s8 }
  0x36   : > { %p5600_p1 = pnand %p5598_p2, %p5936_p13 }
  0x38   : > { %p5601_p6 = pneg %p5600_p1 }
  0x3a   : > { %p5606_p3 = pnand %p5604_p10, %p5601_p6 }
  0x3c   : > { %5609 = shalt.err (!%p5606_p3)
}
  0x3d   : > { %s5610_s13 = scalar_lea.vmem %s5926_s16, 8192  ;;  %p5618_p12 = scmp.lt.s32.totalorder %s5926_s16, %s5926_s16 }
  0x3e   : > { %p5611_p5 = scmp.ne.s32.totalorder %s5926_s16, %s5610_s13  ;;  %p5619_p0 = scmp.lt.s32.totalorder %s5610_s13, %s5610_s13 }
  0x40   : > { %p5613_p7 = pnand %p5611_p5, %p5936_p13  ;;  %p5620_p2 = por %p5619_p0, %p5618_p12 }
  0x42   : > { %p5614_p9 = pneg %p5613_p7 }
  0x44   : > { %p5621_p1 = pnand %p5620_p2, %p5614_p9 }
  0x46   : > { %5624 = shalt.err (!%p5621_p1)
}
  0x47   : > { %s5791_s11 = smov 512   ;;  %s5792_s9 = smov 32  }
  0x48   : > { %5414 = dma.hbm_to_vmem [thread:$0]  (!%p5922_p11), %s6652_s8, 8192, %s5926_s16, [#allocation9], %s5791_s11, %s5791_s11, %s5792_s9  }
  0x49   : > { %s5793_s18 = smov [#allocation7]   ;;  %s5625_s26 = scalar_lea.hbm %s6648_s4, 2048 }
  0x4a   : > { %s349_s28 = sshll.u32 %s5793_s18, 4  ;;  %p5626_p6 = scmp.ne.s32.totalorder %s6648_s4, %s5625_s26  ;;  %s350_s28 = int_to_ptr.vmem [resolvable:$true] %s349_s28 }
  0x4b   : > { %p5632_p5 = scmp.lt.u32.totalorder %s5625_s26, %s6648_s4 }
  0x4c   : > { %p5628_p10 = pnand %p5626_p6, %p5936_p13 }
  0x4e   : > { %p5629_p3 = pneg %p5628_p10 }
  0x50   : > { %p5634_p7 = pnand %p5632_p5, %p5629_p3 }
  0x52   : > { %5637 = shalt.err (!%p5634_p7)
}
  0x53   : > { %s5638_s16 = scalar_lea.vmem %s350_s28, 2048  ;;  %p5646_p2 = scmp.lt.s32.totalorder %s350_s28, %s350_s28 }
  0x54   : > { %p5639_p9 = scmp.ne.s32.totalorder %s350_s28, %s5638_s16  ;;  %p5647_p1 = scmp.lt.s32.totalorder %s5638_s16, %s5638_s16 }
  0x56   : > { %p5641_p12 = pnand %p5639_p9, %p5936_p13  ;;  %p5648_p4 = por %p5647_p1, %p5646_p2 }
  0x58   : > { %p5642_p0 = pneg %p5641_p12 }
  0x5a   : > { %p5649_p8 = pnand %p5648_p4, %p5642_p0 }
  0x5c   : > { %5652 = shalt.err (!%p5649_p8)
}
  0x5d   : > { %s5794_s11 = smov 128   ;;  %s5795_s9 = smov 8  }
  0x5e   : > { %5411 = dma.hbm_to_vmem [thread:$0]  (!%p5922_p11), %s6648_s4, 2048, %s350_s28, [#allocation6], %s5794_s11, %s5794_s11, %s5795_s9  }
  0x5f   : > { %s5796_s21 = smov [#allocation10]   ;;  %s5653_s26 = scalar_lea.hbm %s6654_s10, 8192 }
  0x60   : > { %s387_s18 = sshll.u32 %s5796_s21, 4  ;;  %p5654_p4 = scmp.ne.s32.totalorder %s6654_s10, %s5653_s26  ;;  %s388_s18 = int_to_ptr.vmem [resolvable:$true] %s387_s18 }
  0x61   : > { %p5660_p10 = scmp.lt.u32.totalorder %s5653_s26, %s6654_s10 }
  0x62   : > { %p5656_p8 = pnand %p5654_p4, %p5936_p13 }
  0x64   : > { %p5657_p6 = pneg %p5656_p8 }
  0x66   : > { %p5662_p3 = pnand %p5660_p10, %p5657_p6 }
  0x68   : > { %5665 = shalt.err (!%p5662_p3)
}
  0x69   : > { %s5666_s28 = scalar_lea.vmem %s388_s18, 8192  ;;  %p5674_p12 = scmp.lt.s32.totalorder %s388_s18, %s388_s18 }
  0x6a   : > { %p5667_p5 = scmp.ne.s32.totalorder %s388_s18, %s5666_s28  ;;  %p5675_p0 = scmp.lt.s32.totalorder %s5666_s28, %s5666_s28 }
  0x6c   : > { %p5669_p7 = pnand %p5667_p5, %p5936_p13  ;;  %p5676_p2 = por %p5675_p0, %p5674_p12 }
  0x6e   : > { %p5670_p9 = pneg %p5669_p7 }
  0x70   : > { %p5677_p1 = pnand %p5676_p2, %p5670_p9 }
  0x72   : > { %5680 = shalt.err (!%p5677_p1)
}
  0x73   : > { %5417 = dma.hbm_to_vmem [thread:$0]  (!%p5922_p11), %s6654_s10, 8192, %s388_s18, [#allocation9], %s5794_s11, %s5794_s11, %s5795_s9  }
  0x74   : > { %s6023_s30 = sadd.s32 1, %s5785_s24   ;;  %s37_s14 = sadd.s32 1, %s5781_s23 }
  0x75   : > { %s34_s21 = ssub.s32 %s5785_s24, %s6023_s30  ;;  %p44_p13 = scmp.ne.s32.totalorder %s5781_s23, %s5777_s22 }
  0x76   : > { %p35_p4 = scmp.eq.s32.totalorder %s34_s21, 0  ;;  %p45_p8 = scmp.eq.s32.totalorder %s5785_s24, 0 }
  0x77   : > { %p6675_p6 = scmp.eq.s32.totalorder %s5892_s25, 1  ;;  %p5430_p3 = scmp.lt.s32.totalorder %s5785_s24, 2 }
  0x78   : > { %s6039_s20 = scalar_select %p35_p4, %s5781_s23, %s37_s14  }
  0x79   : > { %p6033_p10 = por %p6675_p6, %p44_p13  ;;  %p46_p5 = por %p45_p8, %p44_p13 }
  0x7a   : > { %s404_s26 = sand.u32 1, %s5781_s23   ;;  %s4689_s18 = sshll.u32 %s5785_s24, 9 }
  0x7b   : > { %s4604_s15 = sshll.u32 %s404_s26, 5  ;;  %s6046_s16 = scalar_lea.hbm %s6644_s0, %s4689_s18 }
  0x7c   : > { %s408_s28 = scalar_lea.vmem [#allocation2], %s4604_s15  ;;  %p6050_p11 = pnand %p5430_p3, %p46_p5 }
  0x7d   : > { %s415_s3 = sshll.u32 %s408_s28, 4  ;;  %s6054_s14 = scalar_lea.sflag [#allocation3], %s404_s26  ;;  %s6048_s3 = int_to_ptr.vmem [resolvable:$true] %s415_s3 }
  0x7e   : > { %s5681_s21 = scalar_lea.hbm %s6046_s16, 512  ;;  %p5683_p9 = pneg %p6050_p11 }
  0x7f   : > { %p5682_p7 = scmp.ne.s32.totalorder %s6046_s16, %s5681_s21  ;;  %s5686_s17 = scalar_lea.hbm %s6644_s0, 1024 }
  0x80   : > { %p5687_p2 = scmp.lt.u32.totalorder %s6046_s16, %s6644_s0  ;;  %p5688_p1 = scmp.lt.u32.totalorder %s5686_s17, %s5681_s21 }
  0x81   : > { %p5684_p12 = pnand %p5683_p9, %p5682_p7  ;;  %p5690_p4 = scmp.lt.u32.totalorder %s5681_s21, %s6046_s16 }
  0x82   : > { %p5689_p13 = por %p5688_p1, %p5687_p2 }
  0x83   : > { %p5685_p0 = pneg %p5684_p12 }
  0x84   : > { %p5691_p8 = por %p5690_p4, %p5689_p13 }
  0x86   : > { %p5692_p6 = pnand %p5691_p8, %p5685_p0 }
  0x88   : > { %5695 = shalt.err (!%p5692_p6)
}
  0x89   : > { %s5696_s26 = scalar_lea.vmem %s6048_s3, 512  ;;  %s5797_s15 = smov [#allocation2]  }
  0x8a   : > { %p5697_p3 = scmp.ne.s32.totalorder %s6048_s3, %s5696_s26  ;;  %s5701_s18 = sshll.u32 %s5797_s15, 4  ;;  %s5702_s18 = int_to_ptr.vmem [resolvable:$false] %s5701_s18 }
  0x8b   : > { %s5703_s13 = scalar_lea.vmem %s5702_s18, 1024  ;;  %p5704_p12 = scmp.lt.s32.totalorder %s6048_s3, %s5702_s18 }
  0x8c   : > { %p5699_p5 = pnand %p5697_p3, %p5683_p9  ;;  %p5705_p2 = scmp.lt.s32.totalorder %s5703_s13, %s5696_s26 }
  0x8e   : > { %p5700_p7 = pneg %p5699_p5  ;;  %p5706_p1 = por %p5705_p2, %p5704_p12 }
  0x90   : > { %p5707_p13 = pnand %p5706_p1, %p5700_p7 }
  0x92   : > { %5710 = shalt.err (!%p5707_p13)
}
  0x93   : > { %5421 = dma.hbm_to_vmem [thread:$0]  (!%p6050_p11), %s6046_s16, 512, %s6048_s3, %s6054_s14, %s5794_s11, %s5794_s11, %s5795_s9  }
  0x94   : > { %p6678_p9 = scmp.ne.s32.totalorder %s6671_s29, 0 }
  0x95   : > { %s6088_s21 = sand.u32 (!%p6678_p9), 1, %s5777_s22   ;;  %p6679_p0 = scmp.ne.s32.totalorder (!%p6678_p9), %s6668_s27, 0 }
  0x96   : > { %427 = sbr.rel (%p6678_p9) target bundleno = 4107 (0x100b), region = 68  ;;  %s4608_s17 = sshll.u32 (!%p6678_p9), %s6088_s21, 5 }
  0x97   : > { %s430_s28 = scalar_lea.sflag (!%p6678_p9), [#allocation3], %s6088_s21  ;;  %s6094_s12 = scalar_lea.vmem (!%p6678_p9), [#allocation2], %s4608_s17 }
  0x9d   : > { %5756 = dma.done.wait (%p6679_p0), %s430_s28, 512  }
  0x9e   : > { %5758 = vsyncadd (%p6679_p0), %s430_s28, 4294966784  ;;  %p6680_p11 = scmp.eq.s32.totalorder %s5892_s25, 0 }
  0xa0   : > { %5760 = dma.done.wait (%p6680_p11), [#allocation6], 8192   ;;  %p6681_p4 = pmov %p6680_p11 }
  0xa2   : > { %5762 = vsyncadd (%p6681_p4), [#allocation6], 4294959104  ;;  %p6682_p8 = pmov %p6681_p4 }
  0xa3   : > { %p6683_p6 = pmov %p6681_p4 }
  0xa4   : > { %5764 = dma.done.wait (%p6682_p8), [#allocation9], 16384  }
  0xa5   : > { %5766 = vsyncadd (%p6683_p6), [#allocation9], 4294950912  ;;  %v492_v0 = vld [vmem:[%s6094_s12] sm:$0xff]  ;;  %v494_v1 = vld [vmem:[%s6094_s12 + $0x10] sm:$0xff]  ;;  %vm5799_vm0 = vmmov 0   ;;  %vm790_vm1 = vcmask 261120  }
  0xa6   : > { %496 = vadd.xlane.f32.xlu0 %v492_v0  ;;  %500 = vadd.xlane.f32.xlu1 %v494_v1  ;;  %v493_v2 = vld [vmem:[%s6094_s12 + $0x8] sm:$0xff]  ;;  %v495_v3 = vld [vmem:[%s6094_s12 + $0x18] sm:$0xff]  ;;  %v567_v5 = vld [vmem:[#allocation5 + $0x20] sm:$0xff]  ;;  %vm1105_vm3 = vcmask 64512   ;;  %s5800_s16 = smov 96   ;;  %s5801_s3 = smov 64  }
  0xa7   : > { %v564_v4 = vld [vmem:[#allocation5 + $0x8] sm:$0xff]  ;;  %v563_v6 = vld [vmem:[#allocation5] sm:$0xff]  ;;  %v566_v8 = vld [vmem:[#allocation5 + $0x18] sm:$0xff]  ;;  %s5802_s14 = smov 32   ;;  %s6686_s11 = sld [smem:[#allocation19_spill]] }
  0xa8   : > { %v5149_v7 = vpack.c.bf16 %v567_v5, %v564_v4  ;;  %v570_v9 = vld [vmem:[#allocation5 + $0x38] sm:$0xff]  ;;  %v573_v10 = vld [vmem:[#allocation5 + $0x50] sm:$0xff]  ;;  %v5151_v11 = vpack.c.bf16 %v566_v8, %v563_v6  ;;  %v568_v14 = vld [vmem:[#allocation5 + $0x28] sm:$0xff]  ;;  %s4690_s26 = sshll.u32 %s5892_s25, 9  ;;  %s6688_s13 = sld [smem:[#allocation21_spill]] }
  0xa9   : > { %v5153_v12 = vpack.c.bf16 %v573_v10, %v570_v9  ;;  %v565_v13 = vld [vmem:[#allocation5 + $0x10] sm:$0xff]  ;;  %v572_v17 = vld [vmem:[#allocation5 + $0x48] sm:$0xff]  ;;  %v579_v19 = vld [vmem:[#allocation5 + $0x80] sm:$0xff]  ;;  %s5803_s25 = smov [#allocation11]  }
  0xaa   : > { %498 = vadd.xlane.f32.xlu0 %v493_v2  ;;  %502 = vadd.xlane.f32.xlu1 %v495_v3  ;;  %v569_v15 = vld [vmem:[#allocation5 + $0x30] sm:$0xff]  ;;  %v5181_v16 = vpack.c.bf16 %v568_v14, %v565_v13  ;;  %v576_v18 = vld [vmem:[#allocation5 + $0x68] sm:$0xff]  ;;  %v571_v21 = vld [vmem:[#allocation5 + $0x40] sm:$0xff]  ;;  %s5715_s29 = sshll.u32 %s5803_s25, 4  ;;  %s5716_s29 = int_to_ptr.vmem [resolvable:$false] %s5715_s29 }
  0xab   : > { %5150 = vmatprep.subr.bf16.mxu0 %v5149_v7  ;;  %v5155_v20 = vpack.c.bf16 %v572_v17, %v569_v15  ;;  %v574_v22 = vld [vmem:[#allocation5 + $0x58] sm:$0xff]  ;;  %v5157_v23 = vpack.c.bf16 %v579_v19, %v576_v18  ;;  %v575_v25 = vld [vmem:[#allocation5 + $0x60] sm:$0xff]  ;;  %v585_v45 = vld [vmem:[#allocation5 + $0xb0] sm:$0xff]  ;;  %v5798_v19 = vmov 0.0  }
  0xac   : > { %5152 = vmatpush1.bf16.msra.mxu0 %v5151_v11  ;;  %5182 = vmatprep.subr.bf16.mxu1 %v5181_v16  ;;  %v5185_v24 = vpack.c.bf16 %v574_v22, %v571_v21  ;;  %v578_v26 = vld [vmem:[#allocation5 + $0x78] sm:$0xff]  ;;  %v577_v46 = vld [vmem:[#allocation5 + $0x70] sm:$0xff]  ;;  %v580_v48 = vld [vmem:[#allocation5 + $0x88] sm:$0xff] }
  0xad   : > { %5154 = vmatprep.subr.bf16.mxu0 %v5153_v12  ;;  %5184 = vmatpush3.bf16.msra.mxu1 %v5181_v16  ;;  %v5159_v27 = vpack.c.bf16 %v578_v26, %v575_v25  ;;  %v582_v44 = vld [vmem:[#allocation5 + $0x98] sm:$0xff]  ;;  %v581_v49 = vld [vmem:[#allocation5 + $0x90] sm:$0xff]  ;;  %v584_v50 = vld [vmem:[#allocation5 + $0xa8] sm:$0xff]  ;;  %v5189_v51 = vpack.c.bf16 %v580_v48, %v577_v46 }
  0xae   : > { %5186 = vmatprep.subr.bf16.mxu1 %v5185_v24  ;;  %v5161_v47 = vpack.c.bf16 %v585_v45, %v582_v44  ;;  %v5163_v52 = vpack.c.bf16 %v584_v50, %v581_v49  ;;  %v588_v53 = vld [vmem:[#allocation5 + $0xc8] sm:$0xff]  ;;  %v591_v54 = vld [vmem:[#allocation5 + $0xe0] sm:$0xff]  ;;  %v586_v57 = vld [vmem:[#allocation5 + $0xb8] sm:$0xff]  ;;  %675 = vmatprep.mubr.f32.mxu0 %v5798_v19  ;;  %s6599_s28 = scalar_lea.hbm %s6688_s13, %s4690_s26 }
  0xaf   : > { %v583_v55 = vld [vmem:[#allocation5 + $0xa0] sm:$0xff]  ;;  %v5165_v56 = vpack.c.bf16 %v591_v54, %v588_v53  ;;  %v590_v59 = vld [vmem:[#allocation5 + $0xd8] sm:$0xff]  ;;  %v597_v63 = vld [vmem:[#allocation5 + $0x110] sm:$0xff] }
  0xb0   : > { %5156 = vmatpush1.bf16.msra.mxu0 %v5155_v20  ;;  %v587_v58 = vld [vmem:[#allocation5 + $0xc0] sm:$0xff]  ;;  %v5193_v60 = vpack.c.bf16 %v586_v57, %v583_v55  ;;  %v594_v62 = vld [vmem:[#allocation5 + $0xf8] sm:$0xff]  ;;  %v596_v4 = vld [vmem:[#allocation5 + $0x108] sm:$0xff] }
  0xb1   : > { %5158 = vmatprep.subr.bf16.mxu0 %v5157_v23  ;;  %5188 = vmatpush3.bf16.msra.mxu1 %v5185_v24  ;;  %v5167_v61 = vpack.c.bf16 %v590_v59, %v587_v58  ;;  %v600_v7 = vld [vmem:[#allocation5 + $0x128] sm:$0xff]  ;;  %v603_v8 = vld [vmem:[#allocation5 + $0x140] sm:$0xff]  ;;  %v598_v11 = vld [vmem:[#allocation5 + $0x118] sm:$0xff] }
  0xb2   : > { %5190 = vmatprep.subr.bf16.mxu1 %v5189_v51  ;;  %v595_v9 = vld [vmem:[#allocation5 + $0x100] sm:$0xff]  ;;  %v5173_v10 = vpack.c.bf16 %v603_v8, %v600_v7  ;;  %v602_v13 = vld [vmem:[#allocation5 + $0x138] sm:$0xff]  ;;  %v609_v17 = vld [vmem:[#allocation5 + $0x170] sm:$0xff]  ;;  %v785_v7 = vlaneseq }
  0xb3   : > { %v599_v12 = vld [vmem:[#allocation5 + $0x120] sm:$0xff]  ;;  %v5201_v14 = vpack.c.bf16 %v598_v11, %v595_v9  ;;  %v606_v16 = vld [vmem:[#allocation5 + $0x158] sm:$0xff]  ;;  %v601_v18 = vld [vmem:[#allocation5 + $0x130] sm:$0xff] }
  0xb4   : > { %5160 = vmatpush1.bf16.msra.mxu0 %v5159_v27  ;;  %v5175_v15 = vpack.c.bf16 %v602_v13, %v599_v12  ;;  %v5177_v20 = vpack.c.bf16 %v609_v17, %v606_v16  ;;  %v604_v21 = vld [vmem:[#allocation5 + $0x148] sm:$0xff]  ;;  %v605_v22 = vld [vmem:[#allocation5 + $0x150] sm:$0xff]  ;;  %v607_v26 = vld [vmem:[#allocation5 + $0x160] sm:$0xff]  ;;  %v788_v11 = vand.u32 127, %v785_v7 }
  0xb5   : > { %5162 = vmatprep.subr.bf16.mxu0 %v5161_v47  ;;  %5192 = vmatpush3.bf16.msra.mxu1 %v5189_v51  ;;  %v608_v23 = vld [vmem:[#allocation5 + $0x168] sm:$0xff]  ;;  %v5205_v24 = vpack.c.bf16 %v604_v21, %v601_v18  ;;  %v610_v27 = vld [vmem:[#allocation5 + $0x178] sm:$0xff]  ;;  %v4614_v46 = vld [vmem:[%s6645_s1] ss:$0 sm:$0xff] }
  0xb6   : > { %5194 = vmatprep.subr.bf16.mxu1 %v5193_v60  ;;  %v5179_v25 = vpack.c.bf16 %v608_v23, %v605_v22  ;;  %v4615_v48 = vld [vmem:[%s6646_s2] ss:$0 sm:$0xff] }
  0xb8   : > { %5164 = vmatpush1.bf16.msra.mxu0 %v5163_v52 }
  0xb9   : > { %5166 = vmatprep.subr.bf16.mxu0 %v5165_v56  ;;  %5196 = vmatpush3.bf16.msra.mxu1 %v5193_v60 }
  0xbc   : > { %5168 = vmatpush1.bf16.msra.mxu0 %v5167_v61 }
 0x133   : > { %v497_v28 = vpop.xlane.xlu0 %496  ;;  %v501_v29 = vpop.xlane.xlu1 %500 }
 0x134   : > { %v505_v30 = vmul.f32 0.0078125, %v497_v28  ;;  %v507_v31 = vmul.f32 0.0078125, %v501_v29  ;;  %v5209_v28 = vpack.c.bf16 %v610_v27, %v607_v26 }
 0x136   : > { %v6112_v32 = vsub.f32 %v492_v0, %v505_v30  ;;  %v6114_v33 = vsub.f32 %v494_v1, %v507_v31  ;;  %v589_v0 = vld [vmem:[#allocation5 + $0xd0] sm:$0xff]  ;;  %v5169_v1 = vpack.c.bf16 %v597_v63, %v594_v62 }
 0x137   : > { %v499_v34 = vpop.xlane.xlu0 %498  ;;  %v503_v35 = vpop.xlane.xlu1 %502 }
 0x138   : > { %v506_v36 = vmul.f32 0.0078125, %v499_v34  ;;  %v513_v37 = vmul.f32 %v6112_v32, %v6112_v32  ;;  %v508_v38 = vmul.f32 0.0078125, %v503_v35  ;;  %v515_v41 = vmul.f32 %v6114_v33, %v6114_v33  ;;  %5170 = vmatprep.subr.bf16.mxu0 %v5169_v1 }
 0x13a   : > { %v6118_v39 = vsub.f32 %v493_v2, %v506_v36  ;;  %517 = vadd.xlane.f32.xlu0 %v513_v37  ;;  %v6120_v40 = vsub.f32 %v495_v3, %v508_v38  ;;  %v592_v2 = vld [vmem:[#allocation5 + $0xe8] sm:$0xff]  ;;  %v593_v3 = vld [vmem:[#allocation5 + $0xf0] sm:$0xff] }
 0x13b   : > { %v5197_v5 = vpack.c.bf16 %v592_v2, %v589_v0  ;;  %v5171_v6 = vpack.c.bf16 %v596_v4, %v593_v3 }
 0x13c   : > { %v514_v42 = vmul.f32 %v6118_v39, %v6118_v39  ;;  %v516_v43 = vmul.f32 %v6120_v40, %v6120_v40 }
 0x13d   : > { %5198 = vmatprep.subr.bf16.mxu1 %v5197_v5  ;;  %5172 = vmatpush1.bf16.msra.mxu0 %v5171_v6 }
 0x13e   : > { %521 = vadd.xlane.f32.xlu0 %v515_v41  ;;  %519 = vadd.xlane.f32.xlu1 %v514_v42 }
 0x13f   : > { %5200 = vmatpush3.bf16.msra.mxu1 %v5197_v5  ;;  %5174 = vmatprep.subr.bf16.mxu0 %v5173_v10  ;;  %v6204_v10 = vshrl.u32 %v785_v7, 7 }
 0x140   : > { %5202 = vmatprep.subr.bf16.mxu1 %v5201_v14 }
 0x141   : > { %5176 = vmatpush1.bf16.msra.mxu0 %v5175_v15  ;;  %vm6207_vm2 = vcmp.le.s32.totalorder %v788_v11, %v6204_v10 }
 0x142   : > { %523 = vadd.xlane.f32.xlu1 %v516_v43  ;;  %5178 = vmatprep.subr.bf16.mxu0 %v5177_v20 }
 0x143   : > { %5204 = vmatpush3.bf16.msra.mxu1 %v5201_v14 }
 0x144   : > { %5206 = vmatprep.subr.bf16.mxu1 %v5205_v24 }
 0x145   : > { %5180 = vmatpush1.bf16.msra.mxu0 %v5179_v25 }
 0x146   : > { %4953 = vmatprep.subr.mxu0 %v5798_v19 }
 0x147   : > { %5208 = vmatpush3.bf16.msra.mxu1 %v5205_v24 }
 0x148   : > { %5210 = vmatprep.subr.bf16.mxu1 %v5209_v28 }
 0x14b   : > { %5212 = vmatpush3.bf16.msra.mxu1 %v5209_v28 }
 0x14c   : > { %4933 = vmatprep.subr.mxu1 %v5798_v19 }
 0x1c7   : > { %v518_v29 = vpop.xlane.xlu0 %517 }
 0x1c8   : > { %v525_v30 = vmul.f32 0.0078125, %v518_v29 }
 0x1ca   : > { %v529_v31 = vadd.f32 1e-05, %v525_v30 }
 0x1cb   : > { %v520_v34 = vpop.xlane.xlu1 %519  ;;  %v522_v35 = vpop.xlane.xlu0 %521 }
 0x1cc   : > { %5485 = vrsqrt.f32 %v529_v31  ;;  %v526_v36 = vmul.f32 0.0078125, %v520_v34  ;;  %v527_v37 = vmul.f32 0.0078125, %v522_v35 }
 0x1ce   : > { %v530_v38 = vadd.f32 1e-05, %v526_v36  ;;  %v531_v41 = vadd.f32 1e-05, %v527_v37 }
 0x1cf   : > { %v524_v42 = vpop.xlane.xlu1 %523 }
 0x1d0   : > { %5487 = vrsqrt.f32 %v530_v38  ;;  %v528_v43 = vmul.f32 0.0078125, %v524_v42 }
 0x1d1   : > { %5489 = vrsqrt.f32 %v531_v41 }
 0x1d2   : > { %v532_v44 = vadd.f32 1e-05, %v528_v43 }
 0x1d4   : > { %5491 = vrsqrt.f32 %v532_v44 }
 0x1d6   : > { %v5486_v45 = vpop.eup %5485 }
 0x1d7   : > { %v537_v47 = vmul.f32 %v5486_v45, %v6112_v32 }
 0x1d9   : > { %v548_v49 = vmul.f32 %v4614_v46, %v537_v47 }
 0x1da   : > { %v5488_v50 = vpop.eup %5487 }
 0x1db   : > { %v5490_v51 = vpop.eup %5489  ;;  %v559_v52 = vadd.f32 %v4615_v48, %v548_v49  ;;  %v538_v53 = vmul.f32 %v5488_v50, %v6118_v39 }
 0x1dc   : > { %v539_v54 = vmul.f32 %v5490_v51, %v6114_v33 }
 0x1dd   : > { %676 = vmatmul.mubr.f32.vlgmr.msra.gmra.mrb[0].mxu0 %v559_v52  ;;  %4927 = vmatprep.mubr.f32.mxu1 %v559_v52  ;;  %v549_v55 = vmul.f32 %v4614_v46, %v538_v53 }
 0x1de   : > { %v5492_v56 = vpop.eup %5491  ;;  %681 = vmatprep.mubr.f32.mxu0 %v5798_v19  ;;  %v550_v57 = vmul.f32 %v4614_v46, %v539_v54 }
 0x1df   : > { %v560_v32 = vadd.f32 %v4615_v48, %v549_v55  ;;  %v540_v58 = vmul.f32 %v5492_v56, %v6120_v40 }
 0x1e0   : > { %v561_v59 = vadd.f32 %v4615_v48, %v550_v57 }
 0x1e1   : > { %682 = vmatmul.mubr.f32.gmra.mrb[2].mxu0 %v560_v32  ;;  %4928 = vmatmul.mubr.f32.vlgmr.msra.gmra.mrb[0].mxu1 %v560_v32  ;;  %v551_v60 = vmul.f32 %v4614_v46, %v540_v58 }
 0x1e2   : > { %4930 = vmatprep.mubr.f32.mxu1 %v561_v59  ;;  %687 = vmatprep.mubr.f32.mxu0 %v5798_v19 }
 0x1e3   : > { %v562_v39 = vadd.f32 %v4615_v48, %v551_v60 }
 0x1e5   : > { %688 = vmatmul.mubr.f32.gmra.mrb[4].mxu0 %v561_v59  ;;  %4931 = vmatmul.mubr.f32.gmra.mrb[2].mxu1 %v562_v39 }
 0x1e6   : > { %693 = vmatprep.mubr.f32.mxu0 %v5798_v19  ;;  %4935 = vmatprep.mubr.msk.f32.mxu1 %vm5799_vm0, %v5798_v19 }
 0x1e9   : > { %694 = vmatmul.mubr.f32.gmra.mrb[6].mxu0 %v562_v39 }
 0x1ea   : > { %4955 = vmatprep.mubr.msk.f32.mxu0 %vm5799_vm0, %v5798_v19 }
 0x2b0   : > { %v6148_v33 = vpop.f32.mrb[0].mxu0 }
 0x2b1   : > { %v6150_v40 = vpop.f32.mrb[1].mxu0 }
 0x2b2   : > { %4934 = vmatpush3.xpose.msk.msra.mxu1 %vm790_vm1, %v6150_v40 }
 0x2b3   : > { %4938 = vmatprep.subr.mxu1 %v5798_v19 }
 0x2b4   : > { %v6155_v61 = vpop.f32.mrb[2].mxu0  ;;  %v6157_v62 = vpop.f32.mrb[0].mxu1 }
 0x2b5   : > { %v6159_v63 = vpop.f32.mrb[3].mxu0  ;;  %v6161_v0 = vpop.f32.mrb[1].mxu1  ;;  %4936 = vmatmul.mubr.msk.f32.vlgmr.msra.gmra.mrb[4].mxu1 %vm790_vm1, %v6148_v33 }
 0x2b6   : > { %4939 = vmatpush3.xpose.msk.msra.mxu1 %vm790_vm1, %v6159_v63  ;;  %4954 = vmatpush3.msra.mxu0 %v6161_v0 }
 0x2b7   : > { %4940 = vmatprep.mubr.msk.f32.mxu1 %vm5799_vm0, %v5798_v19  ;;  %4943 = vmatprep.subr.mxu1 %v5798_v19 }
 0x2b8   : > { %v6171_v1 = vpop.f32.mrb[4].mxu0  ;;  %v6173_v2 = vpop.f32.mrb[2].mxu1  ;;  %4963 = vmatprep.subr.mxu0 %v5798_v19 }
 0x2b9   : > { %v6176_v3 = vpop.f32.mrb[5].mxu0  ;;  %v6178_v4 = vpop.f32.mrb[3].mxu1  ;;  %4941 = vmatmul.mubr.msk.f32.vlgmr.msra.gmra.mrb[6].mxu1 %vm790_vm1, %v6155_v61 }
 0x2ba   : > { %4944 = vmatpush3.xpose.msk.msra.mxu1 %vm790_vm1, %v6176_v3  ;;  %4945 = vmatprep.mubr.msk.f32.mxu1 %vm5799_vm0, %v5798_v19 }
 0x2bb   : > { %4948 = vmatprep.subr.mxu1 %v5798_v19 }
 0x2bc   : > { %v6187_v5 = vpop.f32.mrb[6].mxu0 }
 0x2bd   : > { %v6189_v6 = vpop.f32.mrb[7].mxu0  ;;  %4946 = vmatmul.mubr.msk.f32.vlgmr.msra.gmra.mrb[8].mxu1 %vm790_vm1, %v6171_v1 }
 0x2be   : > { %4949 = vmatpush3.xpose.msk.msra.mxu1 %vm790_vm1, %v6189_v6  ;;  %4950 = vmatprep.mubr.msk.f32.mxu1 %vm5799_vm0, %v5798_v19 }
 0x2bf   : > { %4958 = vmatprep.subr.mxu1 %v5798_v19 }
 0x2c1   : > { %4951 = vmatmul.mubr.msk.f32.vlgmr.msra.gmra.mrb[10].mxu1 %vm790_vm1, %v6187_v5 }
 0x2c2   : > { %4959 = vmatpush3.msra.mxu1 %v6157_v62  ;;  %4960 = vmatprep.mubr.msk.f32.mxu1 %vm5799_vm0, %v5798_v19 }
 0x2c3   : > { %4968 = vmatprep.subr.mxu1 %v5798_v19 }
 0x388   : > { %v863_v8 = vpop.f32.mrb[4].mxu1 }
 0x389   : > { %v4937_v9 = vpop.f32.mrb[5].mxu1  ;;  %v1095_v38 = vmul.f32 0.17677669, %v863_v8 }
 0x38b   : > { %v1101_v41 = vsel %vm6207_vm2, %v1095_v38, -1e+30 }
 0x38c   : > { %v939_v12 = vpop.f32.mrb[6].mxu1  ;;  %v1106_v42 = vsel %vm1105_vm3, %v1101_v41, -inf }
 0x38d   : > { %v1096_v13 = vmul.f32 0.17677669, %v939_v12  ;;  %v4942_v14 = vpop.f32.mrb[7].mxu1 }
 0x38f   : > { %v1102_v16 = vsel %vm6207_vm2, %v1096_v13, -1e+30 }
 0x390   : > { %v1015_v17 = vpop.f32.mrb[8].mxu1  ;;  %v1109_v18 = vsel %vm1105_vm3, %v1102_v16, -inf }
 0x391   : > { %1110 = vmax.xlane.f32.xlu0 %v1109_v18  ;;  %v4947_v20 = vpop.f32.mrb[9].mxu1  ;;  %v1097_v43 = vmul.f32 0.17677669, %v1015_v17 }
 0x393   : > { %v1103_v44 = vsel %vm6207_vm2, %v1097_v43, -1e+30 }
 0x394   : > { %v1091_v21 = vpop.f32.mrb[10].mxu1  ;;  %v1112_v45 = vsel %vm1105_vm3, %v1103_v44, -inf }
 0x395   : > { %v1098_v22 = vmul.f32 0.17677669, %v1091_v21  ;;  %v4952_v23 = vpop.f32.mrb[11].mxu1 }
 0x397   : > { %v1104_v24 = vsel %vm6207_vm2, %v1098_v22, -1e+30 }
 0x398   : > { %v1115_v25 = vsel %vm1105_vm3, %v1104_v24, -inf }
 0x399   : > { %1116 = vmax.xlane.f32.xlu1 %v1115_v25 }
 0x3aa   : > { %1524 = vrot.lane.b32.xlu1 %v6155_v61, %s5800_s16 }
 0x41e   : > { %v1111_v26 = vpop.xlane.xlu0 %1110 }
 0x41f   : > { %v1119_v27 = vsub.f32 %v1102_v16, %v1111_v26 }
 0x421   : > { %v1124_v28 = vmul.f32 1.442695, %v1119_v27 }
 0x423   : > { %5493 = vpow2.f32 %v1124_v28 }
 0x426   : > { %v1117_v29 = vpop.xlane.xlu1 %1116 }
 0x427   : > { %v1121_v30 = vsub.f32 %v1104_v24, %v1117_v29 }
 0x429   : > { %v1128_v31 = vmul.f32 1.442695, %v1121_v30 }
 0x42a   : > { %v1525_v47 = vpop.permute.xlu1 %1524 }
 0x42b   : > { %5495 = vpow2.f32 %v1128_v31 }
 0x42d   : > { %v5494_v34 = vpop.eup %5493 }
 0x42e   : > { %v1133_v35 = vsel %vm1105_vm3, %v5494_v34, 0.0 }
 0x42f   : > { %1134 = vadd.xlane.f32.xlu0 %v1133_v35 }
 0x435   : > { %v5496_v36 = vpop.eup %5495 }
 0x436   : > { %v1139_v37 = vsel %vm1105_vm3, %v5496_v36, 0.0 }
 0x437   : > { %1140 = vadd.xlane.f32.xlu1 %v1139_v37 }
 0x445   : > { %1526 = vrot.lane.b32.xlu0 %v6159_v63, %s5800_s16 }
 0x448   : > { %1682 = vrot.lane.b32.xlu1 %v6189_v6, %s5800_s16 }
 0x44c   : > { %1680 = vrot.lane.b32.xlu1 %v6187_v5, %s5800_s16 }
 0x464   : > { %1107 = vmax.xlane.f32.xlu0 %v1106_v42 }
 0x470   : > { %1113 = vmax.xlane.f32.xlu1 %v1112_v45 }
 0x4bc   : > { %v1135_v46 = vpop.xlane.xlu0 %1134 }
 0x4bd   : > { %5497 = vrcp.f32 %v1135_v46 }
 0x4c0   : > { %v1527_v53 = vpop.permute.xlu0 %1526 }
 0x4c4   : > { %v1141_v48 = vpop.xlane.xlu1 %1140 }
 0x4c5   : > { %5499 = vrcp.f32 %v1141_v48 }
 0x4c7   : > { %v5498_v49 = vpop.eup %5497 }
 0x4c8   : > { %v1147_v50 = vmul.f32 %v5498_v49, %v5494_v34  ;;  %v1683_v54 = vpop.permute.xlu1 %1682 }
 0x4ca   : > { %4961 = vmatmul.mubr.msk.f32.vlgmr.msra.gmra.mrb[12].mxu1 %vm1105_vm3, %v1147_v50 }
 0x4cb   : > { %4969 = vmatpush3.msra.mxu1 %v6173_v2  ;;  %4970 = vmatprep.mubr.msk.f32.mxu1 %vm5799_vm0, %v5798_v19 }
 0x4cc   : > { %4978 = vmatprep.subr.mxu1 %v5798_v19  ;;  %v1681_v55 = vpop.permute.xlu1 %1680 }
 0x4cf   : > { %v5500_v51 = vpop.eup %5499 }
 0x4d0   : > { %v1149_v52 = vmul.f32 %v5500_v51, %v5496_v36 }
 0x4d2   : > { %4971 = vmatmul.mubr.msk.f32.vlgmr.msra.gmra.mrb[14].mxu1 %vm1105_vm3, %v1149_v52 }
 0x4d3   : > { %4979 = vmatpush3.xpose.msk.msra.mxu1 %vm790_vm1, %v1527_v53  ;;  %4980 = vmatprep.mubr.msk.f32.mxu1 %vm5799_vm0, %v5798_v19 }
 0x4d4   : > { %4988 = vmatprep.subr.mxu1 %v5798_v19 }
 0x4d6   : > { %4981 = vmatmul.mubr.msk.f32.vlgmr.msra.gmra.mrb[16].mxu1 %vm790_vm1, %v1525_v47 }
 0x4d7   : > { %4989 = vmatpush3.xpose.msk.msra.mxu1 %vm790_vm1, %v1683_v54  ;;  %4990 = vmatprep.mubr.msk.f32.mxu1 %vm5799_vm0, %v5798_v19 }
 0x4d8   : > { %4998 = vmatprep.subr.mxu1 %v5798_v19 }
 0x4da   : > { %4991 = vmatmul.mubr.msk.f32.vlgmr.msra.gmra.mrb[18].mxu1 %vm790_vm1, %v1681_v55 }
 0x4db   : > { %5000 = vmatprep.mubr.msk.f32.mxu1 %vm5799_vm0, %v5798_v19 }
 0x4f1   : > { %v1108_v60 = vpop.xlane.xlu0 %1107 }
 0x4f2   : > { %v1118_v8 = vsub.f32 %v1101_v41, %v1108_v60 }
 0x4f4   : > { %v1122_v9 = vmul.f32 1.442695, %v1118_v8 }
 0x4fd   : > { %v1114_v56 = vpop.xlane.xlu1 %1113 }
 0x4fe   : > { %v1120_v57 = vsub.f32 %v1103_v44, %v1114_v56 }
 0x500   : > { %v1126_v32 = vmul.f32 1.442695, %v1120_v57 }
 0x502   : > { %5501 = vpow2.f32 %v1126_v32 }
 0x503   : > { %5503 = vpow2.f32 %v1122_v9 }
 0x50c   : > { %v5502_v58 = vpop.eup %5501 }
 0x50d   : > { %v1136_v59 = vsel %vm1105_vm3, %v5502_v58, 0.0  ;;  %v5504_v25 = vpop.eup %5503 }
 0x50e   : > { %1137 = vadd.xlane.f32.xlu1 %v1136_v59  ;;  %v1130_v26 = vsel %vm1105_vm3, %v5504_v25, 0.0 }
 0x51f   : > { %1446 = vrot.lane.b32.xlu1 %v6148_v33, %s5800_s16 }
 0x523   : > { %1604 = vrot.lane.b32.xlu1 %v6176_v3, %s5800_s16 }
 0x527   : > { %1602 = vrot.lane.b32.xlu1 %v6171_v1, %s5800_s16 }
 0x52b   : > { %2042 = vrot.lane.b32.xlu1 %v6173_v2, %s5800_s16 }
 0x52f   : > { %2316 = vrot.lane.b32.xlu1 %v6148_v33, %s5801_s3 }
 0x59b   : > { %v1138_v36 = vpop.xlane.xlu1 %1137 }
 0x59d   : > { %v6262_v39 = vpop.f32.mrb[12].mxu1 }
 0x59e   : > { %v4962_v7 = vpop.f32.mrb[13].mxu1 }
 0x59f   : > { %v1447_v47 = vpop.permute.xlu1 %1446 }
 0x5a3   : > { %v1605_v49 = vpop.permute.xlu1 %1604 }
 0x5a5   : > { %v6264_v11 = vpop.f32.mrb[14].mxu1 }
 0x5a6   : > { %v4972_v12 = vpop.f32.mrb[15].mxu1 }
 0x5a7   : > { %v1603_v50 = vpop.permute.xlu1 %1602 }
 0x5a9   : > { %v1598_v13 = vpop.f32.mrb[16].mxu1 }
 0x5aa   : > { %v1759_v14 = vmul.f32 0.17677669, %v1598_v13  ;;  %v4982_v16 = vpop.f32.mrb[17].mxu1 }
 0x5ab   : > { %v2043_v51 = vpop.permute.xlu1 %2042 }
 0x5ac   : > { %v1763_v17 = vsel %vm6207_vm2, %v1759_v14, -1e+30 }
 0x5ad   : > { %v1754_v18 = vpop.f32.mrb[18].mxu1  ;;  %v1769_v20 = vsel %vm1105_vm3, %v1763_v17, -inf }
 0x5ae   : > { %v1761_v21 = vmul.f32 0.17677669, %v1754_v18  ;;  %1770 = vmax.xlane.f32.xlu0 %v1769_v20  ;;  %v4992_v22 = vpop.f32.mrb[19].mxu1 }
 0x5af   : > { %v2317_v52 = vpop.permute.xlu1 %2316 }
 0x5b0   : > { %v1765_v23 = vsel %vm6207_vm2, %v1761_v21, -1e+30 }
 0x5b1   : > { %v1775_v24 = vsel %vm1105_vm3, %v1765_v23, -inf }
 0x5b2   : > { %1776 = vmax.xlane.f32.xlu0 %v1775_v24 }
 0x5b6   : > { %1131 = vadd.xlane.f32.xlu0 %v1130_v26 }
 0x5cc   : > { %1448 = vrot.lane.b32.xlu0 %v6150_v40, %s5800_s16 }
 0x63b   : > { %v1771_v27 = vpop.xlane.xlu0 %1770 }
 0x63c   : > { %v1779_v28 = vsub.f32 %v1763_v17, %v1771_v27 }
 0x63e   : > { %v1784_v29 = vmul.f32 1.442695, %v1779_v28 }
 0x63f   : > { %v1777_v30 = vpop.xlane.xlu0 %1776 }
 0x640   : > { %5505 = vpow2.f32 %v1784_v29  ;;  %v1781_v31 = vsub.f32 %v1765_v23, %v1777_v30 }
 0x642   : > { %v1788_v34 = vmul.f32 1.442695, %v1781_v31 }
 0x643   : > { %v1132_v35 = vpop.xlane.xlu0 %1131 }
 0x644   : > { %5507 = vpow2.f32 %v1788_v34 }
 0x645   : > { %5509 = vrcp.f32 %v1132_v35 }
 0x646   : > { %5511 = vrcp.f32 %v1138_v36 }
 0x647   : > { %v1449_v48 = vpop.permute.xlu0 %1448 }
 0x64a   : > { %v5506_v37 = vpop.eup %5505 }
 0x64b   : > { %v1793_v38 = vsel %vm1105_vm3, %v5506_v37, 0.0 }
 0x64c   : > { %1794 = vadd.xlane.f32.xlu0 %v1793_v38 }
 0x64e   : > { %v5508_v41 = vpop.eup %5507 }
 0x64f   : > { %v5510_v42 = vpop.eup %5509  ;;  %v1799_v43 = vsel %vm1105_vm3, %v5508_v41, 0.0 }
 0x650   : > { %v1146_v44 = vmul.f32 %v5510_v42, %v5504_v25  ;;  %1800 = vadd.xlane.f32.xlu1 %v1799_v43  ;;  %v5512_v45 = vpop.eup %5511 }
 0x651   : > { %v1148_v46 = vmul.f32 %v5512_v45, %v5502_v58 }
 0x652   : > { %4956 = vmatmul.mubr.msk.f32.vlgmr.msra.gmra.mrb[8].mxu0 %vm1105_vm3, %v1146_v44 }
 0x653   : > { %4964 = vmatpush3.msra.mxu0 %v6178_v4  ;;  %4965 = vmatprep.mubr.msk.f32.mxu0 %vm5799_vm0, %v5798_v19 }
 0x654   : > { %4973 = vmatprep.subr.mxu0 %v5798_v19 }
 0x656   : > { %4966 = vmatmul.mubr.msk.f32.vlgmr.msra.gmra.mrb[10].mxu0 %vm1105_vm3, %v1148_v46 }
 0x657   : > { %4975 = vmatprep.mubr.msk.f32.mxu0 %vm5799_vm0, %v5798_v19 }
 0x65a   : > { %4974 = vmatpush3.xpose.msk.msra.mxu0 %vm790_vm1, %v1449_v48 }
 0x65b   : > { %4983 = vmatprep.subr.mxu0 %v5798_v19 }
 0x65d   : > { %4976 = vmatmul.mubr.msk.f32.vlgmr.msra.gmra.mrb[12].mxu0 %vm790_vm1, %v1447_v47 }
 0x65e   : > { %4984 = vmatpush3.xpose.msk.msra.mxu0 %vm790_vm1, %v1605_v49  ;;  %4985 = vmatprep.mubr.msk.f32.mxu0 %vm5799_vm0, %v5798_v19 }
 0x65f   : > { %4993 = vmatprep.subr.mxu0 %v5798_v19 }
 0x661   : > { %4986 = vmatmul.mubr.msk.f32.vlgmr.msra.gmra.mrb[14].mxu0 %vm790_vm1, %v1603_v50  ;;  %2394 = vrot.lane.b32.xlu1 %v6155_v61, %s5801_s3 }
 0x662   : > { %1888 = vrot.lane.b32.xlu0 %v6157_v62, %s5800_s16  ;;  %4995 = vmatprep.mubr.msk.f32.mxu0 %vm5799_vm0, %v5798_v19 }
 0x665   : > { %2472 = vrot.lane.b32.xlu1 %v6171_v1, %s5801_s3 }
 0x666   : > { %2318 = vrot.lane.b32.xlu0 %v6150_v40, %s5801_s3 }
 0x669   : > { %2550 = vrot.lane.b32.xlu1 %v6187_v5, %s5801_s3 }
 0x66a   : > { %2396 = vrot.lane.b32.xlu0 %v6159_v63, %s5801_s3 }
 0x66e   : > { %2474 = vrot.lane.b32.xlu0 %v6176_v3, %s5801_s3 }
 0x672   : > { %2552 = vrot.lane.b32.xlu0 %v6189_v6, %s5801_s3 }
 0x6d9   : > { %v1795_v53 = vpop.xlane.xlu0 %1794 }
 0x6da   : > { %5513 = vrcp.f32 %v1795_v53 }
 0x6dd   : > { %v1801_v54 = vpop.xlane.xlu1 %1800  ;;  %v1889_v55 = vpop.permute.xlu0 %1888 }
 0x6de   : > { %5515 = vrcp.f32 %v1801_v54  ;;  %4999 = vmatpush3.msra.mxu1 %v1889_v55 }
 0x6df   : > { %5008 = vmatprep.subr.mxu1 %v5798_v19 }
 0x6e1   : > { %v2319_v58 = vpop.permute.xlu0 %2318  ;;  %v2395_v7 = vpop.permute.xlu1 %2394 }
 0x6e4   : > { %v5514_v56 = vpop.eup %5513 }
 0x6e5   : > { %v1807_v57 = vmul.f32 %v5514_v56, %v5506_v37  ;;  %v2397_v60 = vpop.permute.xlu0 %2396  ;;  %v2473_v9 = vpop.permute.xlu1 %2472 }
 0x6e7   : > { %5001 = vmatmul.mubr.msk.f32.vlgmr.msra.gmra.mrb[20].mxu1 %vm1105_vm3, %v1807_v57 }
 0x6e8   : > { %v5516_v32 = vpop.eup %5515  ;;  %5009 = vmatpush3.msra.mxu1 %v2043_v51  ;;  %5010 = vmatprep.mubr.msk.f32.mxu1 %vm5799_vm0, %v5798_v19 }
 0x6e9   : > { %v1809_v59 = vmul.f32 %v5516_v32, %v5508_v41  ;;  %5041 = vmatprep.subr.mxu1 %v5798_v19  ;;  %v2475_v8 = vpop.permute.xlu0 %2474  ;;  %v2551_v13 = vpop.permute.xlu1 %2550 }
 0x6eb   : > { %5011 = vmatmul.mubr.msk.f32.vlgmr.msra.gmra.mrb[22].mxu1 %vm1105_vm3, %v1809_v59 }
 0x6ec   : > { %5043 = vmatprep.mubr.msk.f32.mxu1 %vm5799_vm0, %v5798_v19 }
 0x6ed   : > { %v2553_v12 = vpop.permute.xlu0 %2552 }
 0x6ef   : > { %5042 = vmatpush3.xpose.msk.msra.mxu1 %vm790_vm1, %v2319_v58 }
 0x6f0   : > { %5046 = vmatprep.subr.mxu1 %v5798_v19 }
 0x6f2   : > { %5044 = vmatmul.mubr.msk.f32.vlgmr.msra.gmra.mrb[24].mxu1 %vm790_vm1, %v2317_v52 }
 0x6f3   : > { %5047 = vmatpush3.xpose.msk.msra.mxu1 %vm790_vm1, %v2397_v60  ;;  %5048 = vmatprep.mubr.msk.f32.mxu1 %vm5799_vm0, %v5798_v19 }
 0x6f4   : > { %5051 = vmatprep.subr.mxu1 %v5798_v19 }
 0x6f6   : > { %5049 = vmatmul.mubr.msk.f32.vlgmr.msra.gmra.mrb[26].mxu1 %vm790_vm1, %v2395_v7 }
 0x6f7   : > { %5052 = vmatpush3.xpose.msk.msra.mxu1 %vm790_vm1, %v2475_v8  ;;  %5053 = vmatprep.mubr.msk.f32.mxu1 %vm5799_vm0, %v5798_v19 }
 0x6f8   : > { %5056 = vmatprep.subr.mxu1 %v5798_v19 }
 0x6fa   : > { %5054 = vmatmul.mubr.msk.f32.vlgmr.msra.gmra.mrb[28].mxu1 %vm790_vm1, %v2473_v9 }
 0x6fb   : > { %5057 = vmatpush3.xpose.msk.msra.mxu1 %vm790_vm1, %v2553_v12  ;;  %5058 = vmatprep.mubr.msk.f32.mxu1 %vm5799_vm0, %v5798_v19 }
 0x6fc   : > { %5061 = vmatprep.subr.mxu1 %v5798_v19 }
 0x6fe   : > { %5059 = vmatmul.mubr.msk.f32.vlgmr.msra.gmra.mrb[30].mxu1 %vm790_vm1, %v2551_v13 }
 0x6ff   : > { %5063 = vmatprep.mubr.msk.f32.mxu1 %vm5799_vm0, %v5798_v19 }
 0x725   : > { %v6339_v14 = vpop.f32.mrb[8].mxu0 }
 0x726   : > { %v4957_v16 = vpop.f32.mrb[9].mxu0 }
 0x729   : > { %v6341_v17 = vpop.f32.mrb[10].mxu0 }
 0x72a   : > { %v4967_v18 = vpop.f32.mrb[11].mxu0 }
 0x730   : > { %v1520_v20 = vpop.f32.mrb[12].mxu0 }
 0x731   : > { %v1758_v21 = vmul.f32 0.17677669, %v1520_v20  ;;  %v4977_v22 = vpop.f32.mrb[13].mxu0 }
 0x733   : > { %v1762_v23 = vsel %vm6207_vm2, %v1758_v21, -1e+30 }
 0x734   : > { %v1676_v24 = vpop.f32.mrb[14].mxu0  ;;  %v1766_v25 = vsel %vm1105_vm3, %v1762_v23, -inf }
 0x735   : > { %v1760_v26 = vmul.f32 0.17677669, %v1676_v24  ;;  %1767 = vmax.xlane.f32.xlu0 %v1766_v25  ;;  %v4987_v27 = vpop.f32.mrb[15].mxu0 }
 0x737   : > { %v1764_v28 = vsel %vm6207_vm2, %v1760_v26, -1e+30 }
 0x738   : > { %v1772_v29 = vsel %vm1105_vm3, %v1764_v28, -inf }
 0x739   : > { %1773 = vmax.xlane.f32.xlu1 %v1772_v29 }
 0x7ba   : > { %v6349_v30 = vpop.f32.mrb[20].mxu1 }
 0x7bb   : > { %v5002_v31 = vpop.f32.mrb[21].mxu1 }
 0x7be   : > { %v6351_v34 = vpop.f32.mrb[22].mxu1 }
 0x7bf   : > { %v5012_v35 = vpop.f32.mrb[23].mxu1 }
 0x7c2   : > { %v1768_v36 = vpop.xlane.xlu0 %1767 }
 0x7c3   : > { %v1778_v37 = vsub.f32 %v1762_v23, %v1768_v36 }
 0x7c5   : > { %v1782_v38 = vmul.f32 1.442695, %v1778_v37  ;;  %v2390_v41 = vpop.f32.mrb[24].mxu1  ;;  %v2121_v37 = vld [vmem:[#allocation7 + $0x38] sm:$0xff] }
 0x7c6   : > { %v1774_v42 = vpop.xlane.xlu1 %1773  ;;  %v2628_v43 = vmul.f32 0.17677669, %v2390_v41  ;;  %v5045_v44 = vpop.f32.mrb[25].mxu1  ;;  %v1442_v41 = vld [vmem:[#allocation7] sm:$0xff] }
 0x7c7   : > { %v1780_v45 = vsub.f32 %v1764_v28, %v1774_v42  ;;  %5517 = vpow2.f32 %v1782_v38  ;;  %v1443_v42 = vld [vmem:[#allocation7 + $0x8] sm:$0xff] }
 0x7c8   : > { %v2632_v46 = vsel %vm6207_vm2, %v2628_v43, -1e+30  ;;  %v5221_v43 = vpack.c.bf16 %v1443_v42, %v1442_v41 }
 0x7c9   : > { %v1786_v47 = vmul.f32 1.442695, %v1780_v45  ;;  %v6355_v48 = vpop.f32.mrb[26].mxu1  ;;  %v2636_v49 = vsel %vm1105_vm3, %v2632_v46, -inf }
 0x7ca   : > { %2637 = vmax.xlane.f32.xlu0 %v2636_v49  ;;  %v5050_v50 = vpop.f32.mrb[27].mxu1  ;;  %v2629_v35 = vmul.f32 0.17677669, %v6355_v48 }
 0x7cb   : > { %5519 = vpow2.f32 %v1786_v47 }
 0x7cd   : > { %v2546_v51 = vpop.f32.mrb[28].mxu1 }
 0x7ce   : > { %v2630_v52 = vmul.f32 0.17677669, %v2546_v51  ;;  %v5055_v53 = vpop.f32.mrb[29].mxu1 }
 0x7d0   : > { %v2634_v54 = vsel %vm6207_vm2, %v2630_v52, -1e+30 }
 0x7d1   : > { %v2624_v55 = vpop.f32.mrb[30].mxu1  ;;  %v2642_v56 = vsel %vm1105_vm3, %v2634_v54, -inf  ;;  %v5518_v57 = vpop.eup %5517 }
 0x7d2   : > { %2643 = vmax.xlane.f32.xlu0 %v2642_v56  ;;  %v5060_v32 = vpop.f32.mrb[31].mxu1  ;;  %v1790_v59 = vsel %vm1105_vm3, %v5518_v57, 0.0 }
 0x7d5   : > { %v5520_v58 = vpop.eup %5519 }
 0x7d6   : > { %v1796_v60 = vsel %vm1105_vm3, %v5520_v58, 0.0  ;;  %1791 = vadd.xlane.f32.xlu0 %v1790_v59 }
 0x7d7   : > { %1797 = vadd.xlane.f32.xlu1 %v1796_v60 }
 0x7e8   : > { %1965 = vrot.lane.b32.xlu1 %v6178_v4, %s5800_s16 }
 0x7ec   : > { %1811 = vrot.lane.b32.xlu0 %v6161_v0, %s5800_s16 }
 0x857   : > { %v2638_v7 = vpop.xlane.xlu0 %2637 }
 0x858   : > { %v2648_v8 = vsub.f32 %v2632_v46, %v2638_v7 }
 0x85a   : > { %v2652_v9 = vmul.f32 1.442695, %v2648_v8 }
 0x85c   : > { %5521 = vpow2.f32 %v2652_v9 }
 0x85f   : > { %v2644_v12 = vpop.xlane.xlu0 %2643 }
 0x860   : > { %v2650_v13 = vsub.f32 %v2634_v54, %v2644_v12 }
 0x862   : > { %v2656_v16 = vmul.f32 1.442695, %v2650_v13  ;;  %v1444_v13 = vld [vmem:[#allocation7 + $0x10] sm:$0xff] }
 0x863   : > { %v1792_v18 = vpop.xlane.xlu0 %1791 }
 0x864   : > { %5523 = vpow2.f32 %v2656_v16  ;;  %v1798_v20 = vpop.xlane.xlu1 %1797  ;;  %v1445_v16 = vld [vmem:[#allocation7 + $0x18] sm:$0xff] }
 0x865   : > { %5525 = vrcp.f32 %v1792_v18 }
 0x866   : > { %v5522_v21 = vpop.eup %5521  ;;  %5527 = vrcp.f32 %v1798_v20  ;;  %v5225_v20 = vpack.c.bf16 %v1445_v16, %v1444_v13 }
 0x867   : > { %v1812_v22 = vpop.permute.xlu0 %1811  ;;  %v2660_v23 = vsel %vm1105_vm3, %v5522_v21, 0.0 }
 0x868   : > { %2661 = vadd.xlane.f32.xlu1 %v2660_v23  ;;  %4994 = vmatpush3.msra.mxu0 %v1812_v22  ;;  %v1966_v29 = vpop.permute.xlu1 %1965 }
 0x869   : > { %5003 = vmatprep.subr.mxu0 %v5798_v19 }
 0x86e   : > { %v6369_v24 = vpop.eup %5523 }
 0x86f   : > { %v2666_v25 = vsel %vm1105_vm3, %v6369_v24, 0.0  ;;  %v5526_v26 = vpop.eup %5525 }
 0x870   : > { %2667 = vadd.xlane.f32.xlu0 %v2666_v25  ;;  %v1806_v27 = vmul.f32 %v5526_v26, %v5518_v57  ;;  %v5528_v28 = vpop.eup %5527 }
 0x871   : > { %v1808_v31 = vmul.f32 %v5528_v28, %v5520_v58 }
 0x872   : > { %4996 = vmatmul.mubr.msk.f32.vlgmr.msra.gmra.mrb[16].mxu0 %vm1105_vm3, %v1806_v27 }
 0x873   : > { %5004 = vmatpush3.msra.mxu0 %v1966_v29  ;;  %5005 = vmatprep.mubr.msk.f32.mxu0 %vm5799_vm0, %v5798_v19 }
 0x876   : > { %5006 = vmatmul.mubr.msk.f32.vlgmr.msra.gmra.mrb[18].mxu0 %vm1105_vm3, %v1808_v31 }
 0x879   : > { %2832 = vrot.lane.b32.xlu1 %v6178_v4, %s5801_s3 }
 0x87d   : > { %3091 = vrot.lane.b32.xlu1 %v6150_v40, %s5802_s14  ;;  %v2119_v40 = vld [vmem:[#allocation7 + $0x28] sm:$0xff] }
 0x881   : > { %3089 = vrot.lane.b32.xlu1 %v6148_v33, %s5802_s14  ;;  %v2118_v33 = vld [vmem:[#allocation7 + $0x20] sm:$0xff] }
 0x885   : > { %3167 = vrot.lane.b32.xlu1 %v6155_v61, %s5802_s14  ;;  %v5213_v61 = vpack.c.bf16 %v2119_v40, %v2118_v33 }
 0x886   : > { %2680 = vrot.lane.b32.xlu0 %v6161_v0, %s5801_s3 }
 0x887   : > { %5214 = vmatprep.subr.bf16.mxu0 %v5213_v61 }
 0x888   : > { %5216 = vmatpush3.bf16.msra.mxu0 %v5213_v61 }
 0x889   : > { %3245 = vrot.lane.b32.xlu1 %v6171_v1, %s5802_s14  ;;  %v2631_v1 = vmul.f32 0.17677669, %v2624_v55 }
 0x88a   : > { %3169 = vrot.lane.b32.xlu0 %v6159_v63, %s5802_s14  ;;  %v2633_v63 = vsel %vm6207_vm2, %v2629_v35, -1e+30 }
 0x88b   : > { %v2639_v36 = vsel %vm1105_vm3, %v2633_v63, -inf }
 0x88d   : > { %3323 = vrot.lane.b32.xlu1 %v6187_v5, %s5802_s14  ;;  %v2635_v5 = vsel %vm6207_vm2, %v2631_v1, -1e+30 }
 0x88e   : > { %3247 = vrot.lane.b32.xlu0 %v6176_v3, %s5802_s14  ;;  %v2645_v3 = vsel %vm1105_vm3, %v2635_v5, -inf }
 0x892   : > { %3325 = vrot.lane.b32.xlu0 %v6189_v6, %s5802_s14  ;;  %v2120_v6 = vld [vmem:[#allocation7 + $0x30] sm:$0xff] }
 0x893   : > { %v5217_v38 = vpack.c.bf16 %v2121_v37, %v2120_v6 }
 0x895   : > { %5218 = vmatprep.subr.bf16.mxu0 %v5217_v38 }
 0x896   : > { %5220 = vmatpush3.bf16.msra.mxu0 %v5217_v38 }
 0x897   : > { %5222 = vmatprep.subr.bf16.mxu0 %v5221_v43 }
 0x8b1   : > { %2640 = vmax.xlane.f32.xlu0 %v2639_v36  ;;  %2646 = vmax.xlane.f32.xlu1 %v2645_v3 }
 0x8c2   : > { %2908 = vrot.lane.b32.xlu1 %v6173_v2, %s5801_s3 }
 0x8f5   : > { %v2662_v44 = vpop.xlane.xlu1 %2661 }
 0x8f6   : > { %5529 = vrcp.f32 %v2662_v44 }
 0x8f9   : > { %v2833_v45 = vpop.permute.xlu1 %2832 }
 0x8fd   : > { %v2668_v46 = vpop.xlane.xlu0 %2667  ;;  %v3092_v50 = vpop.permute.xlu1 %3091 }
 0x8fe   : > { %5531 = vrcp.f32 %v2668_v46 }
 0x900   : > { %v5530_v47 = vpop.eup %5529 }
 0x901   : > { %v2676_v48 = vmul.f32 %v5530_v47, %v5522_v21  ;;  %v2681_v49 = vpop.permute.xlu0 %2680  ;;  %v3090_v52 = vpop.permute.xlu1 %3089 }
 0x902   : > { %5062 = vmatpush3.msra.mxu1 %v2681_v49 }
 0x903   : > { %5064 = vmatmul.mubr.msk.f32.vlgmr.msra.gmra.mrb[32].mxu1 %vm1105_vm3, %v2676_v48  ;;  %5071 = vmatprep.subr.mxu1 %v5798_v19 }
 0x904   : > { %5072 = vmatpush3.msra.mxu1 %v2833_v45  ;;  %5073 = vmatprep.mubr.msk.f32.mxu1 %vm5799_vm0, %v5798_v19 }
 0x905   : > { %5095 = vmatprep.subr.mxu1 %v5798_v19  ;;  %v3170_v54 = vpop.permute.xlu0 %3169  ;;  %v3168_v55 = vpop.permute.xlu1 %3167 }
 0x908   : > { %v5532_v51 = vpop.eup %5531 }
 0x909   : > { %v2678_v53 = vmul.f32 %v5532_v51, %v6369_v24  ;;  %v3248_v56 = vpop.permute.xlu0 %3247  ;;  %v3246_v57 = vpop.permute.xlu1 %3245 }
 0x90b   : > { %5074 = vmatmul.mubr.msk.f32.vlgmr.msra.gmra.mrb[34].mxu1 %vm1105_vm3, %v2678_v53  ;;  %v2985_v53 = vld [vmem:[#allocation7 + $0x48] sm:$0xff] }
 0x90c   : > { %5096 = vmatpush3.xpose.msk.msra.mxu1 %vm790_vm1, %v3092_v50  ;;  %5097 = vmatprep.mubr.msk.f32.mxu1 %vm5799_vm0, %v5798_v19 }
 0x90d   : > { %5100 = vmatprep.subr.mxu1 %v5798_v19  ;;  %v3326_v32 = vpop.permute.xlu0 %3325  ;;  %v3324_v58 = vpop.permute.xlu1 %3323 }
 0x90f   : > { %5098 = vmatmul.mubr.msk.f32.vlgmr.msra.gmra.mrb[36].mxu1 %vm790_vm1, %v3090_v52  ;;  %v2984_v52 = vld [vmem:[#allocation7 + $0x40] sm:$0xff] }
 0x910   : > { %5101 = vmatpush3.xpose.msk.msra.mxu1 %vm790_vm1, %v3170_v54  ;;  %5102 = vmatprep.mubr.msk.f32.mxu1 %vm5799_vm0, %v5798_v19  ;;  %v2986_v54 = vld [vmem:[#allocation7 + $0x50] sm:$0xff] }
 0x911   : > { %5105 = vmatprep.subr.mxu1 %v5798_v19 }
 0x913   : > { %5103 = vmatmul.mubr.msk.f32.vlgmr.msra.gmra.mrb[38].mxu1 %vm790_vm1, %v3168_v55  ;;  %v5229_v55 = vpack.c.bf16 %v2985_v53, %v2984_v52  ;;  %v5565_v52 = vld [vmem:[%s6094_s12 + $0x8] sm:$0xff] }
 0x914   : > { %5106 = vmatpush3.xpose.msk.msra.mxu1 %vm790_vm1, %v3248_v56  ;;  %5107 = vmatprep.mubr.msk.f32.mxu1 %vm5799_vm0, %v5798_v19  ;;  %v2987_v56 = vld [vmem:[#allocation7 + $0x58] sm:$0xff] }
 0x915   : > { %5110 = vmatprep.subr.mxu1 %v5798_v19 }
 0x917   : > { %5108 = vmatmul.mubr.msk.f32.vlgmr.msra.gmra.mrb[40].mxu1 %vm790_vm1, %v3246_v57  ;;  %v5233_v57 = vpack.c.bf16 %v2987_v56, %v2986_v54 }
 0x918   : > { %5111 = vmatpush3.xpose.msk.msra.mxu1 %vm790_vm1, %v3326_v32  ;;  %5112 = vmatprep.mubr.msk.f32.mxu1 %vm5799_vm0, %v5798_v19 }
 0x919   : > { %5120 = vmatprep.subr.mxu1 %v5798_v19 }
 0x91b   : > { %5113 = vmatmul.mubr.msk.f32.vlgmr.msra.gmra.mrb[42].mxu1 %vm790_vm1, %v3324_v58 }
 0x91c   : > { %5122 = vmatprep.mubr.msk.f32.mxu1 %vm5799_vm0, %v5798_v19 }
 0x93e   : > { %v2641_v59 = vpop.xlane.xlu0 %2640  ;;  %v2647_v60 = vpop.xlane.xlu1 %2646 }
 0x93f   : > { %v2649_v7 = vsub.f32 %v2633_v63, %v2641_v59  ;;  %v2651_v8 = vsub.f32 %v2635_v5, %v2647_v60 }
 0x941   : > { %v2654_v9 = vmul.f32 1.442695, %v2649_v7  ;;  %v2658_v12 = vmul.f32 1.442695, %v2651_v8 }
 0x942   : > { %v2909_v6 = vpop.permute.xlu1 %2908 }
 0x943   : > { %5533 = vpow2.f32 %v2654_v9 }
 0x944   : > { %5535 = vpow2.f32 %v2658_v12 }
 0x945   : > { %v1883_v18 = vpop.f32.mrb[16].mxu0 }
 0x946   : > { %v4997_v21 = vpop.f32.mrb[17].mxu0  ;;  %5021 = vmatprep.mubr.msk.f32.mxu0 %vm790_vm1, %v1883_v18 }
 0x947   : > { %5022 = vmatmul.mubr.msk.f32.vlgmr.msra.gmra.mrb[20].mxu0 %vm790_vm1, %v6349_v30 }
 0x948   : > { %5224 = vmatpush3.bf16.msra.mxu0 %v5221_v43 }
 0x949   : > { %v2037_v22 = vpop.f32.mrb[18].mxu0  ;;  %5226 = vmatprep.subr.bf16.mxu0 %v5225_v20 }
 0x94a   : > { %v5007_v23 = vpop.f32.mrb[19].mxu0  ;;  %5024 = vmatprep.mubr.msk.f32.mxu0 %vm790_vm1, %v2037_v22 }
 0x94b   : > { %5025 = vmatmul.mubr.msk.f32.gmra.mrb[22].mxu0 %vm790_vm1, %v6351_v34 }
 0x94c   : > { %5228 = vmatpush3.bf16.msra.mxu0 %v5225_v20  ;;  %5035 = vmatprep.mubr.msk.f32.mxu0 %vm790_vm1, %v6339_v14 }
 0x94d   : > { %v5534_v24 = vpop.eup %5533  ;;  %5066 = vmatprep.subr.mxu0 %v5798_v19 }
 0x94e   : > { %v2663_v25 = vsel %vm1105_vm3, %v5534_v24, 0.0  ;;  %v5536_v26 = vpop.eup %5535 }
 0x94f   : > { %2664 = vadd.xlane.f32.xlu0 %v2663_v25  ;;  %5036 = vmatmul.mubr.msk.f32.vlgmr.msra.gmra.mrb[20].mxu0 %vm790_vm1, %v6262_v39  ;;  %v2669_v30 = vsel %vm1105_vm3, %v5536_v26, 0.0 }
 0x950   : > { %5038 = vmatprep.mubr.msk.f32.mxu0 %vm790_vm1, %v6341_v17 }
 0x953   : > { %2670 = vadd.xlane.f32.xlu0 %v2669_v30  ;;  %5039 = vmatmul.mubr.msk.f32.gmra.mrb[22].mxu0 %vm790_vm1, %v6264_v11 }
 0x954   : > { %5068 = vmatprep.mubr.msk.f32.mxu0 %vm5799_vm0, %v5798_v19 }
 0x969   : > { %2756 = vrot.lane.b32.xlu0 %v6157_v62, %s5801_s3  ;;  %s6687_s3 = sld [smem:[#allocation20_spill]] }
 0x9d6   : > { %v2752_v14 = vpop.f32.mrb[32].mxu1 }
 0x9d7   : > { %v5065_v34 = vpop.f32.mrb[33].mxu1 }
 0x9dc   : > { %v2665_v27 = vpop.xlane.xlu0 %2664 }
 0x9dd   : > { %5537 = vrcp.f32 %v2665_v27 }
 0x9de   : > { %v6456_v39 = vpop.f32.mrb[34].mxu1 }
 0x9df   : > { %v5075_v28 = vpop.f32.mrb[35].mxu1 }
 0x9e0   : > { %v2671_v17 = vpop.xlane.xlu0 %2670 }
 0x9e1   : > { %5539 = vrcp.f32 %v2671_v17 }
 0x9e2   : > { %v3163_v29 = vpop.f32.mrb[36].mxu1 }
 0x9e3   : > { %v3401_v31 = vmul.f32 0.17677669, %v3163_v29  ;;  %v5099_v33 = vpop.f32.mrb[37].mxu1  ;;  %v3758_v29 = vld [vmem:[#allocation7 + $0x68] sm:$0xff] }
 0x9e4   : > { %v2757_v40 = vpop.permute.xlu0 %2756 }
 0x9e5   : > { %5067 = vmatpush3.msra.mxu0 %v2757_v40  ;;  %v3405_v11 = vsel %vm6207_vm2, %v3401_v31, -1e+30 }
 0x9e6   : > { %v3241_v61 = vpop.f32.mrb[38].mxu1  ;;  %v3409_v35 = vsel %vm1105_vm3, %v3405_v11, -inf  ;;  %5076 = vmatprep.subr.mxu0 %v5798_v19 }
 0x9e7   : > { %v5538_v1 = vpop.eup %5537  ;;  %v3402_v63 = vmul.f32 0.17677669, %v3241_v61  ;;  %3410 = vmax.xlane.f32.xlu1 %v3409_v35  ;;  %v5104_v5 = vpop.f32.mrb[39].mxu1 }
 0x9e8   : > { %v2677_v36 = vmul.f32 %v5538_v1, %v5534_v24 }
 0x9e9   : > { %v3406_v3 = vsel %vm6207_vm2, %v3402_v63, -1e+30 }
 0x9ea   : > { %5069 = vmatmul.mubr.msk.f32.vlgmr.msra.gmra.mrb[24].mxu0 %vm1105_vm3, %v2677_v36  ;;  %v3319_v37 = vpop.f32.mrb[40].mxu1  ;;  %v3412_v38 = vsel %vm1105_vm3, %v3406_v3, -inf }
 0x9eb   : > { %v5540_v41 = vpop.eup %5539  ;;  %5077 = vmatpush3.msra.mxu0 %v2909_v6  ;;  %v3403_v42 = vmul.f32 0.17677669, %v3319_v37  ;;  %3413 = vmax.xlane.f32.xlu0 %v3412_v38  ;;  %v5109_v43 = vpop.f32.mrb[41].mxu1  ;;  %v3759_v37 = vld [vmem:[#allocation7 + $0x70] sm:$0xff]  ;;  %v3760_v38 = vld [vmem:[#allocation7 + $0x78] sm:$0xff] }
 0x9ec   : > { %v2679_v44 = vmul.f32 %v5540_v41, %v5536_v26  ;;  %5078 = vmatprep.mubr.msk.f32.mxu0 %vm5799_vm0, %v5798_v19  ;;  %5230 = vmatprep.subr.bf16.mxu0 %v5229_v55  ;;  %v5241_v41 = vpack.c.bf16 %v3760_v38, %v3759_v37 }
 0x9ed   : > { %v3407_v45 = vsel %vm6207_vm2, %v3403_v42, -1e+30 }
 0x9ee   : > { %5079 = vmatmul.mubr.msk.f32.vlgmr.msra.gmra.mrb[26].mxu0 %vm1105_vm3, %v2679_v44  ;;  %v3397_v46 = vpop.f32.mrb[42].mxu1  ;;  %v3415_v47 = vsel %vm1105_vm3, %v3407_v45, -inf }
 0x9ef   : > { %v3404_v48 = vmul.f32 0.17677669, %v3397_v46  ;;  %5089 = vmatprep.mubr.msk.f32.mxu0 %vm790_vm1, %v2752_v14  ;;  %3416 = vmax.xlane.f32.xlu0 %v3415_v47  ;;  %v5114_v49 = vpop.f32.mrb[43].mxu1 }
 0x9f0   : > { %5232 = vmatpush3.bf16.msra.mxu0 %v5229_v55  ;;  %v5566_v55 = vld [vmem:[%s6094_s12] sm:$0xff] }
 0x9f1   : > { %v3408_v50 = vsel %vm6207_vm2, %v3404_v48, -1e+30  ;;  %5234 = vmatprep.subr.bf16.mxu0 %v5233_v57 }
 0x9f2   : > { %v3418_v51 = vsel %vm1105_vm3, %v3408_v50, -inf }
 0x9f3   : > { %3419 = vmax.xlane.f32.xlu1 %v3418_v51  ;;  %v4680_v51 = vld [vmem:[%s6649_s5] ss:$0 sm:$0xff] }
 0x9f4   : > { %5236 = vmatpush3.bf16.msra.mxu0 %v5233_v57 }
 0x9f5   : > { %5115 = vmatprep.subr.mxu0 %v5798_v19 }
 0xa74   : > { %v3411_v32 = vpop.xlane.xlu1 %3410 }
 0xa75   : > { %v3421_v58 = vsub.f32 %v3405_v11, %v3411_v32 }
 0xa77   : > { %v3425_v59 = vmul.f32 1.442695, %v3421_v58 }
 0xa78   : > { %v3414_v15 = vpop.xlane.xlu0 %3413 }
 0xa79   : > { %5541 = vpow2.f32 %v3425_v59  ;;  %v3422_v60 = vsub.f32 %v3406_v3, %v3414_v15  ;;  %v5567_v15 = vld [vmem:[%s6094_s12 + $0x10] sm:$0xff] }
 0xa7b   : > { %v3427_v7 = vmul.f32 1.442695, %v3422_v60 }
 0xa7c   : > { %v3417_v8 = vpop.xlane.xlu0 %3416 }
 0xa7d   : > { %5543 = vpow2.f32 %v3427_v7  ;;  %v3423_v9 = vsub.f32 %v3407_v45, %v3417_v8  ;;  %v5568_v7 = vld [vmem:[%s6094_s12 + $0x18] sm:$0xff]  ;;  %s4473_s12 = scalar_lea.sflag [#allocation4], %s6088_s21 }
 0xa7f   : > { %v3429_v12 = vmul.f32 1.442695, %v3423_v9 }
 0xa80   : > { %v3420_v23 = vpop.xlane.xlu1 %3419 }
 0xa81   : > { %5545 = vpow2.f32 %v3429_v12  ;;  %v3424_v24 = vsub.f32 %v3408_v50, %v3420_v23  ;;  %v3947_v23 = vld [vmem:[#allocation8 + $0x20] sm:$0xff] }
 0xa83   : > { %v5542_v13 = vpop.eup %5541  ;;  %v3431_v25 = vmul.f32 1.442695, %v3424_v24 }
 0xa84   : > { %v3433_v16 = vsel %vm1105_vm3, %v5542_v13, 0.0 }
 0xa85   : > { %3434 = vadd.xlane.f32.xlu0 %v3433_v16  ;;  %5547 = vpow2.f32 %v3431_v25  ;;  %v3948_v16 = vld [vmem:[#allocation8 + $0x28] sm:$0xff] }
 0xa87   : > { %v5544_v18 = vpop.eup %5543 }
 0xa88   : > { %v3436_v20 = vsel %vm1105_vm3, %v5544_v18, 0.0 }
 0xa89   : > { %3437 = vadd.xlane.f32.xlu1 %v3436_v20 }
 0xa8b   : > { %v5546_v21 = vpop.eup %5545 }
 0xa8c   : > { %v3439_v22 = vsel %vm1105_vm3, %v5546_v21, 0.0 }
 0xa8d   : > { %3440 = vadd.xlane.f32.xlu0 %v3439_v22  ;;  %v3943_v22 = vld [vmem:[#allocation8] sm:$0xff] }
 0xa8e   : > { %v5247_v25 = vpack.c.bf16 %v3947_v23, %v3943_v22 }
 0xa8f   : > { %v5548_v30 = vpop.eup %5547 }
 0xa9a   : > { %3529 = vrot.lane.b32.xlu1 %v6157_v62, %s5802_s14  ;;  %v3442_v62 = vsel %vm1105_vm3, %v5548_v30, 0.0 }
 0xa9e   : > { %3605 = vrot.lane.b32.xlu1 %v6178_v4, %s5802_s14 }
 0xaa3   : > { %3453 = vrot.lane.b32.xlu0 %v6161_v0, %s5802_s14 }
 0xabd   : > { %v2828_v26 = vpop.f32.mrb[24].mxu0 }
 0xabe   : > { %v5070_v14 = vpop.f32.mrb[25].mxu0  ;;  %5090 = vmatmul.mubr.msk.f32.vlgmr.msra.gmra.mrb[20].mxu0 %vm790_vm1, %v2828_v26  ;;  %v3945_v26 = vld [vmem:[#allocation8 + $0x10] sm:$0xff] }
 0xabf   : > { %5092 = vmatprep.mubr.msk.f32.mxu0 %vm790_vm1, %v6456_v39  ;;  %v3757_v39 = vld [vmem:[#allocation7 + $0x60] sm:$0xff]  ;;  %v3952_v14 = vld [vmem:[#allocation8 + $0x48] sm:$0xff] }
 0xac0   : > { %v5237_v11 = vpack.c.bf16 %v3758_v29, %v3757_v39  ;;  %v3955_v39 = vld [vmem:[#allocation8 + $0x60] sm:$0xff]  ;;  %v3953_v29 = vld [vmem:[#allocation8 + $0x50] sm:$0xff] }
 0xac1   : > { %v2980_v34 = vpop.f32.mrb[26].mxu0 }
 0xac2   : > { %v5080_v27 = vpop.f32.mrb[27].mxu0  ;;  %5093 = vmatmul.mubr.msk.f32.gmra.mrb[22].mxu0 %vm790_vm1, %v2980_v34  ;;  %3443 = vadd.xlane.f32.xlu1 %v3442_v62  ;;  %v3956_v62 = vld [vmem:[#allocation8 + $0x68] sm:$0xff] }
 0xac3   : > { %5117 = vmatprep.mubr.msk.f32.mxu0 %vm5799_vm0, %v5798_v19  ;;  %v3954_v27 = vld [vmem:[#allocation8 + $0x58] sm:$0xff] }
 0xad3   : > { %3681 = vrot.lane.b32.xlu1 %v6173_v2, %s5802_s14  ;;  %s489_s14 = scalar_lea.vmem [#allocation11], %s4608_s17 }
 0xad4   : > { %s4486_s17 = sshll.u32 %s489_s14, 4  ;;  %s6594_s17 = int_to_ptr.vmem [resolvable:$true] %s4486_s17 }
 0xad5   : > { %s5711_s27 = scalar_lea.vmem %s6594_s17, 512  ;;  %p5718_p12 = scmp.lt.s32.totalorder %s6594_s17, %s5716_s29 }
 0xad6   : > { %p5712_p3 = scmp.ne.s32.totalorder %s6594_s17, %s5711_s27 }
 0xad8   : > { %p5713_p5 = pnand %p5712_p3, %p6033_p10 }
 0xada   : > { %p5714_p7 = pneg %p5713_p5 }
 0xb12   : > { %v3435_v0 = vpop.xlane.xlu0 %3434 }
 0xb13   : > { %5549 = vrcp.f32 %v3435_v0  ;;  %v3958_v0 = vld [vmem:[#allocation8 + $0x78] sm:$0xff] }
 0xb16   : > { %v3438_v4 = vpop.xlane.xlu1 %3437 }
 0xb17   : > { %5551 = vrcp.f32 %v3438_v4  ;;  %v5249_v4 = vpack.c.bf16 %v3956_v62, %v3952_v14  ;;  %v3988_v14 = vld [vmem:[#allocation8 + $0x168] sm:$0xff]  ;;  %v3990_v62 = vld [vmem:[#allocation8 + $0x178] sm:$0xff] }
 0xb1a   : > { %v3441_v28 = vpop.xlane.xlu0 %3440  ;;  %v3530_v17 = vpop.permute.xlu1 %3529 }
 0xb1b   : > { %5553 = vrcp.f32 %v3441_v28  ;;  %5121 = vmatpush3.msra.mxu1 %v3530_v17  ;;  %v5281_v28 = vpack.c.bf16 %v3958_v0, %v3954_v27  ;;  %v3951_v17 = vld [vmem:[#allocation8 + $0x40] sm:$0xff] }
 0xb1c   : > { %5130 = vmatprep.subr.mxu1 %v5798_v19 }
 0xb1d   : > { %v5550_v31 = vpop.eup %5549 }
 0xb1e   : > { %v3449_v33 = vmul.f32 %v5550_v31, %v5542_v13  ;;  %v3454_v40 = vpop.permute.xlu0 %3453  ;;  %v3606_v61 = vpop.permute.xlu1 %3605  ;;  %v3944_v13 = vld [vmem:[#allocation8 + $0x8] sm:$0xff]  ;;  %v5251_v31 = vpack.c.bf16 %v3955_v39, %v3951_v17  ;;  %v3985_v17 = vld [vmem:[#allocation8 + $0x150] sm:$0xff] }
 0xb1f   : > { %5116 = vmatpush3.msra.mxu0 %v3454_v40  ;;  %v5245_v20 = vpack.c.bf16 %v3948_v16, %v3944_v13  ;;  %v3960_v40 = vld [vmem:[#allocation8 + $0x88] sm:$0xff]  ;;  %v3978_v13 = vld [vmem:[#allocation8 + $0x118] sm:$0xff] }
 0xb20   : > { %5118 = vmatmul.mubr.msk.f32.vlgmr.msra.gmra.mrb[28].mxu0 %vm1105_vm3, %v3449_v33  ;;  %5125 = vmatprep.subr.mxu0 %v5798_v19  ;;  %v3957_v33 = vld [vmem:[#allocation8 + $0x70] sm:$0xff] }
 0xb21   : > { %v5552_v2 = vpop.eup %5551  ;;  %5126 = vmatpush3.msra.mxu0 %v3606_v61  ;;  %5127 = vmatprep.mubr.msk.f32.mxu0 %vm5799_vm0, %v5798_v19  ;;  %v5283_v61 = vpack.c.bf16 %v3957_v33, %v3953_v29  ;;  %v3989_v29 = vld [vmem:[#allocation8 + $0x170] sm:$0xff]  ;;  %v3996_v33 = vld [vmem:[#allocation8 + $0x1a8] sm:$0xff] }
 0xb22   : > { %v3450_v35 = vmul.f32 %v5552_v2, %v5544_v18  ;;  %5238 = vmatprep.subr.bf16.mxu0 %v5237_v11  ;;  %v3946_v18 = vld [vmem:[#allocation8 + $0x18] sm:$0xff] }
 0xb24   : > { %5123 = vmatmul.mubr.msk.f32.vlgmr.msra.gmra.mrb[44].mxu1 %vm1105_vm3, %v3450_v35  ;;  %v3962_v35 = vld [vmem:[#allocation8 + $0x98] sm:$0xff] }
 0xb25   : > { %v5554_v1 = vpop.eup %5553  ;;  %5132 = vmatprep.mubr.msk.f32.mxu1 %vm5799_vm0, %v5798_v19 }
 0xb26   : > { %v3451_v63 = vmul.f32 %v5554_v1, %v5546_v21  ;;  %v3950_v21 = vld [vmem:[#allocation8 + $0x38] sm:$0xff] }
 0xb27   : > { %v5277_v24 = vpack.c.bf16 %v3950_v21, %v3946_v18  ;;  %v3966_v1 = vld [vmem:[#allocation8 + $0xb8] sm:$0xff]  ;;  %v3979_v21 = vld [vmem:[#allocation8 + $0x120] sm:$0xff] }
 0xb28   : > { %5128 = vmatmul.mubr.msk.f32.vlgmr.msra.gmra.mrb[30].mxu0 %vm1105_vm3, %v3451_v63  ;;  %v3959_v63 = vld [vmem:[#allocation8 + $0x80] sm:$0xff]  ;;  %v3982_v18 = vld [vmem:[#allocation8 + $0x138] sm:$0xff] }
 0xb29   : > { %5240 = vmatpush3.bf16.msra.mxu0 %v5237_v11  ;;  %v3964_v11 = vld [vmem:[#allocation8 + $0xa8] sm:$0xff]  ;;  %v5293_v22 = vpack.c.bf16 %v3982_v18, %v3978_v13  ;;  %v4271_v13 = vld [vmem:[#allocation10 + $0x180] sm:$0xff] }
 0xb2a   : > { %5242 = vmatprep.subr.bf16.mxu0 %v5241_v41  ;;  %v5253_v2 = vpack.c.bf16 %v3964_v11, %v3960_v40  ;;  %v5299_v40 = vpack.c.bf16 %v3989_v29, %v3985_v17  ;;  %v4272_v18 = vld [vmem:[#allocation10 + $0x188] sm:$0xff]  ;;  %v4255_v17 = vld [vmem:[#allocation10 + $0x100] sm:$0xff]  ;;  %v4241_v29 = vld [vmem:[#allocation10 + $0x90] sm:$0xff] }
 0xb2d   : > { %5244 = vmatpush3.bf16.msra.mxu0 %v5241_v41 }
 0xb2e   : > { %5278 = vmatprep.subr.bf16.mxu0 %v5277_v24  ;;  %v3977_v24 = vld [vmem:[#allocation8 + $0x110] sm:$0xff] }
 0xb4f   : > { %v3444_v5 = vpop.xlane.xlu1 %3443 }
 0xb50   : > { %5555 = vrcp.f32 %v3444_v5  ;;  %v5285_v5 = vpack.c.bf16 %v3966_v1, %v3962_v35  ;;  %v3991_v35 = vld [vmem:[#allocation8 + $0x180] sm:$0xff] }
 0xb53   : > { %v3682_v36 = vpop.permute.xlu1 %3681 }
 0xb54   : > { %5131 = vmatpush3.msra.mxu1 %v3682_v36  ;;  %v3963_v36 = vld [vmem:[#allocation8 + $0xa0] sm:$0xff] }
 0xb55   : > { %5246 = vmatprep.subr.bf16.mxu1 %v5245_v20  ;;  %v5255_v37 = vpack.c.bf16 %v3963_v36, %v3959_v63  ;;  %v3975_v20 = vld [vmem:[#allocation8 + $0x100] sm:$0xff]  ;;  %v3997_v36 = vld [vmem:[#allocation8 + $0x1b0] sm:$0xff] }
 0xb56   : > { %v5263_v23 = vpack.c.bf16 %v3979_v21, %v3975_v20  ;;  %v3995_v63 = vld [vmem:[#allocation8 + $0x1a0] sm:$0xff]  ;;  %v5341_v20 = vpack.c.bf16 %v4272_v18, %v4271_v13  ;;  %v4261_v18 = vld [vmem:[#allocation10 + $0x130] sm:$0xff] }
 0xb5a   : > { %v5556_v3 = vpop.eup %5555 }
 0xb5b   : > { %v3452_v6 = vmul.f32 %v5556_v3, %v5548_v30  ;;  %v3949_v30 = vld [vmem:[#allocation8 + $0x30] sm:$0xff] }
 0xb5c   : > { %v5279_v34 = vpack.c.bf16 %v3949_v30, %v3945_v26  ;;  %v3961_v3 = vld [vmem:[#allocation8 + $0x90] sm:$0xff]  ;;  %v3984_v26 = vld [vmem:[#allocation8 + $0x148] sm:$0xff] }
 0xb5d   : > { %5133 = vmatmul.mubr.msk.f32.vlgmr.msra.gmra.mrb[46].mxu1 %vm1105_vm3, %v3452_v6  ;;  %v3965_v6 = vld [vmem:[#allocation8 + $0xb0] sm:$0xff]  ;;  %v5265_v27 = vpack.c.bf16 %v3988_v14, %v3984_v26 }
 0xb5e   : > { %4093 = vmatprep.mubr.f32.mxu1 %v5798_v19  ;;  %5248 = vmatpush1.bf16.msra.mxu1 %v5247_v25  ;;  %v5287_v38 = vpack.c.bf16 %v3965_v6, %v3961_v3  ;;  %v3981_v25 = vld [vmem:[#allocation8 + $0x130] sm:$0xff]  ;;  %v4000_v3 = vld [vmem:[#allocation8 + $0x1c8] sm:$0xff] }
 0xb5f   : > { %5250 = vmatprep.subr.bf16.mxu1 %v5249_v4  ;;  %v5295_v30 = vpack.c.bf16 %v3981_v25, %v3977_v24  ;;  %v3983_v4 = vld [vmem:[#allocation8 + $0x140] sm:$0xff]  ;;  %v4004_v6 = vld [vmem:[#allocation8 + $0x1e8] sm:$0xff] }
 0xb62   : > { %5252 = vmatpush1.bf16.msra.mxu1 %v5251_v31  ;;  %v3992_v31 = vld [vmem:[#allocation8 + $0x188] sm:$0xff] }
 0xb63   : > { %5254 = vmatprep.subr.bf16.mxu1 %v5253_v2  ;;  %v5269_v11 = vpack.c.bf16 %v3996_v33, %v3992_v31  ;;  %v3998_v2 = vld [vmem:[#allocation8 + $0x1b8] sm:$0xff] }
 0xb64   : > { %v4242_v33 = vld [vmem:[#allocation10 + $0x98] sm:$0xff] }
 0xb66   : > { %5256 = vmatpush1.bf16.msra.mxu1 %v5255_v37  ;;  %v4002_v37 = vld [vmem:[#allocation8 + $0x1d8] sm:$0xff] }
 0xbf3   : > { %v3525_v42 = vpop.f32.mrb[28].mxu0 }
 0xbf4   : > { %v5119_v43 = vpop.f32.mrb[29].mxu0  ;;  %5143 = vmatprep.mubr.msk.f32.mxu0 %vm790_vm1, %v3525_v42 }
 0xbf7   : > { %v3601_v44 = vpop.f32.mrb[44].mxu1 }
 0xbf8   : > { %v5124_v45 = vpop.f32.mrb[45].mxu1  ;;  %5144 = vmatmul.mubr.msk.f32.vlgmr.msra.gmra.mrb[20].mxu0 %vm790_vm1, %v3601_v44 }
 0xbf9   : > { %5280 = vmatpush1.bf16.msra.mxu0 %v5279_v34  ;;  %v3986_v34 = vld [vmem:[#allocation8 + $0x158] sm:$0xff] }
 0xbfa   : > { %5282 = vmatprep.subr.bf16.mxu0 %v5281_v28  ;;  %v5297_v0 = vpack.c.bf16 %v3990_v62, %v3986_v34  ;;  %v3987_v28 = vld [vmem:[#allocation8 + $0x160] sm:$0xff] }
 0xbfb   : > { %v3677_v46 = vpop.f32.mrb[30].mxu0  ;;  %v5267_v39 = vpack.c.bf16 %v3987_v28, %v3983_v4  ;;  %v6553_v34 = vld [vmem:[%s6650_s6] ss:$0 sm:$0xff]  ;;  %v4224_v28 = vld [vmem:[#allocation10 + $0x8] sm:$0xff] }
 0xbfc   : > { %v5129_v47 = vpop.f32.mrb[31].mxu0  ;;  %5146 = vmatprep.mubr.msk.f32.mxu0 %vm790_vm1, %v3677_v46  ;;  %v4223_v4 = vld [vmem:[#allocation10] sm:$0xff] }
 0xbfd   : > { %5284 = vmatpush1.bf16.msra.mxu0 %v5283_v61  ;;  %v3994_v61 = vld [vmem:[#allocation8 + $0x198] sm:$0xff] }
 0xbfe   : > { %5286 = vmatprep.subr.bf16.mxu0 %v5285_v5  ;;  %v5301_v1 = vpack.c.bf16 %v3998_v2, %v3994_v61  ;;  %v3993_v5 = vld [vmem:[#allocation8 + $0x190] sm:$0xff]  ;;  %v5311_v2 = vpack.c.bf16 %v4224_v28, %v4223_v4  ;;  %v4263_v4 = vld [vmem:[#allocation10 + $0x140] sm:$0xff]  ;;  %v4264_v28 = vld [vmem:[#allocation10 + $0x148] sm:$0xff] }
 0xc01   : > { %5288 = vmatpush1.bf16.msra.mxu0 %v5287_v38  ;;  %v5271_v38 = vpack.c.bf16 %v3995_v63, %v3991_v35  ;;  %v4226_v63 = vld [vmem:[#allocation10 + $0x18] sm:$0xff] }
 0xc30   : > { %v3753_v48 = vpop.f32.mrb[46].mxu1 }
 0xc31   : > { %v5134_v49 = vpop.f32.mrb[47].mxu1  ;;  %5147 = vmatmul.mubr.msk.f32.gmra.mrb[22].mxu0 %vm790_vm1, %v3753_v48 }
 0xc32   : > { %4182 = vmatprep.mubr.f32.mxu0 %v5798_v19  ;;  %v3968_v49 = vld [vmem:[#allocation8 + $0xc8] sm:$0xff] }
 0xccb   : > { %v5145_v50 = vpop.f32.mrb[20].mxu0 }
 0xccc   : > { %v3863_v53 = vadd.f32 %v5565_v52, %v5145_v50  ;;  %v3839_v54 = vpop.f32.mrb[21].mxu0  ;;  %v3972_v50 = vld [vmem:[#allocation8 + $0xe8] sm:$0xff] }
 0xccd   : > { %v3862_v56 = vadd.f32 %v5566_v55, %v3839_v54  ;;  %v5257_v52 = vpack.c.bf16 %v3972_v50, %v3968_v49  ;;  %v3967_v54 = vld [vmem:[#allocation8 + $0xc0] sm:$0xff]  ;;  %v4001_v49 = vld [vmem:[#allocation8 + $0x1d0] sm:$0xff] }
 0xcce   : > { %v6516_v57 = vadd.f32 %v4680_v51, %v3863_v53  ;;  %v3974_v53 = vld [vmem:[#allocation8 + $0xf8] sm:$0xff]  ;;  %v3971_v55 = vld [vmem:[#allocation8 + $0xe0] sm:$0xff]  ;;  %v4005_v50 = vld [vmem:[#allocation8 + $0x1f0] sm:$0xff] }
 0xccf   : > { %v6518_v32 = vadd.f32 %v4680_v51, %v3862_v56  ;;  %5258 = vmatprep.subr.bf16.mxu1 %v5257_v52  ;;  %v5307_v52 = vpack.c.bf16 %v4005_v50, %v4001_v49 }
 0xcd0   : > { %3879 = vadd.xlane.f32.xlu1 %v6516_v57 }
 0xcd1   : > { %3877 = vadd.xlane.f32.xlu0 %v6518_v32 }
 0xd04   : > { %v5148_v58 = vpop.f32.mrb[22].mxu0 }
 0xd05   : > { %v3849_v59 = vpop.f32.mrb[23].mxu0  ;;  %v3865_v8 = vadd.f32 %v5568_v7, %v5148_v58  ;;  %v5259_v58 = vpack.c.bf16 %v3971_v55, %v3967_v54  ;;  %v3976_v7 = vld [vmem:[#allocation8 + $0x108] sm:$0xff] }
 0xd06   : > { %v3864_v60 = vadd.f32 %v5567_v15, %v3849_v59  ;;  %v3969_v59 = vld [vmem:[#allocation8 + $0xd0] sm:$0xff] }
 0xd07   : > { %v6527_v12 = vadd.f32 %v4680_v51, %v3865_v8  ;;  %v3973_v15 = vld [vmem:[#allocation8 + $0xf0] sm:$0xff]  ;;  %v3980_v8 = vld [vmem:[#allocation8 + $0x128] sm:$0xff]  ;;  %5260 = vmatpush1.bf16.msra.mxu1 %v5259_v58 }
 0xd08   : > { %v6524_v9 = vadd.f32 %v4680_v51, %v3864_v60  ;;  %v3970_v51 = vld [vmem:[#allocation8 + $0xd8] sm:$0xff]  ;;  %v5291_v60 = vpack.c.bf16 %v3973_v15, %v3969_v59  ;;  %v5261_v16 = vpack.c.bf16 %v3980_v8, %v3976_v7  ;;  %v4239_v7 = vld [vmem:[#allocation10 + $0x80] sm:$0xff]  ;;  %v4240_v8 = vld [vmem:[#allocation10 + $0x88] sm:$0xff] }
 0xd09   : > { %v5289_v56 = vpack.c.bf16 %v3974_v53, %v3970_v51 }
 0xd0a   : > { %3881 = vadd.xlane.f32.xlu0 %v6524_v9  ;;  %5262 = vmatprep.subr.bf16.mxu1 %v5261_v16  ;;  %v5309_v16 = vpack.c.bf16 %v4240_v8, %v4239_v7  ;;  %v4229_v7 = vld [vmem:[#allocation10 + $0x30] sm:$0xff]  ;;  %v4230_v8 = vld [vmem:[#allocation10 + $0x38] sm:$0xff] }
 0xd0b   : > { %5290 = vmatprep.subr.bf16.mxu0 %v5289_v56  ;;  %5264 = vmatpush1.bf16.msra.mxu1 %v5263_v23 }
 0xd0c   : > { %5292 = vmatpush1.bf16.msra.mxu0 %v5291_v60  ;;  %5266 = vmatprep.subr.bf16.mxu1 %v5265_v27  ;;  %v6559_v27 = vld [vmem:[%s6651_s7] ss:$0 sm:$0xff] }
 0xd0d   : > { %5294 = vmatprep.subr.bf16.mxu0 %v5293_v22 }
 0xd0e   : > { %3883 = vadd.xlane.f32.xlu0 %v6527_v12 }
 0xd0f   : > { %5268 = vmatpush1.bf16.msra.mxu1 %v5267_v39  ;;  %v4256_v39 = vld [vmem:[#allocation10 + $0x108] sm:$0xff] }
 0xd10   : > { %5296 = vmatpush1.bf16.msra.mxu0 %v5295_v30  ;;  %5270 = vmatprep.subr.bf16.mxu1 %v5269_v11  ;;  %v4274_v11 = vld [vmem:[#allocation10 + $0x198] sm:$0xff]  ;;  %v5343_v35 = vpack.c.bf16 %v4256_v39, %v4255_v17  ;;  %v4249_v17 = vld [vmem:[#allocation10 + $0xd0] sm:$0xff] }
 0xd11   : > { %5298 = vmatprep.subr.bf16.mxu0 %v5297_v0  ;;  %v4250_v39 = vld [vmem:[#allocation10 + $0xd8] sm:$0xff] }
 0xd13   : > { %5272 = vmatpush1.bf16.msra.mxu1 %v5271_v38  ;;  %v4275_v38 = vld [vmem:[#allocation10 + $0x1a0] sm:$0xff] }
 0xd14   : > { %5300 = vmatpush1.bf16.msra.mxu0 %v5299_v40  ;;  %v4273_v40 = vld [vmem:[#allocation10 + $0x190] sm:$0xff] }
 0xd15   : > { %5302 = vmatprep.subr.bf16.mxu0 %v5301_v1  ;;  %v4225_v1 = vld [vmem:[#allocation10 + $0x10] sm:$0xff] }
 0xd5d   : > { %v3880_v41 = vpop.xlane.xlu1 %3879 }
 0xd5e   : > { %v3886_v42 = vmul.f32 0.0078125, %v3880_v41  ;;  %v3878_v43 = vpop.xlane.xlu0 %3877  ;;  %v4006_v41 = vld [vmem:[#allocation8 + $0x1f8] sm:$0xff] }
 0xd5f   : > { %v3885_v44 = vmul.f32 0.0078125, %v3878_v43  ;;  %v5273_v43 = vpack.c.bf16 %v4004_v6, %v4000_v3  ;;  %v4258_v3 = vld [vmem:[#allocation10 + $0x118] sm:$0xff]  ;;  %v4243_v6 = vld [vmem:[#allocation10 + $0xa0] sm:$0xff] }
 0xd60   : > { %v6531_v45 = vsub.f32 %v6516_v57, %v3886_v42  ;;  %v5303_v42 = vpack.c.bf16 %v3997_v36, %v3993_v5  ;;  %v5313_v5 = vpack.c.bf16 %v4242_v33, %v4241_v29  ;;  %v4257_v36 = vld [vmem:[#allocation10 + $0x110] sm:$0xff] }
 0xd61   : > { %v6534_v46 = vsub.f32 %v6518_v32, %v3885_v44  ;;  %v3999_v44 = vld [vmem:[#allocation8 + $0x1c0] sm:$0xff]  ;;  %5274 = vmatprep.subr.bf16.mxu1 %v5273_v43  ;;  %v5315_v43 = vpack.c.bf16 %v4226_v63, %v4225_v1  ;;  %v4281_v29 = vld [vmem:[#allocation10 + $0x1d0] sm:$0xff]  ;;  %v4266_v1 = vld [vmem:[#allocation10 + $0x158] sm:$0xff] }
 0xd62   : > { %v3894_v47 = vmul.f32 %v6531_v45, %v6531_v45  ;;  %5304 = vmatpush1.bf16.msra.mxu0 %v5303_v42  ;;  %v4251_v63 = vld [vmem:[#allocation10 + $0xe0] sm:$0xff] }
 0xd63   : > { %v3893_v48 = vmul.f32 %v6534_v46, %v6534_v46 }
 0xd64   : > { %3899 = vadd.xlane.f32.xlu1 %v3894_v47  ;;  %v4003_v47 = vld [vmem:[#allocation8 + $0x1e0] sm:$0xff] }
 0xd65   : > { %3897 = vadd.xlane.f32.xlu0 %v3893_v48  ;;  %v5305_v48 = vpack.c.bf16 %v4006_v41, %v4002_v37  ;;  %v5275_v51 = vpack.c.bf16 %v4003_v47, %v3999_v44  ;;  %v4244_v37 = vld [vmem:[#allocation10 + $0xa8] sm:$0xff]  ;;  %v5347_v44 = vpack.c.bf16 %v4258_v3, %v4257_v36  ;;  %v4227_v47 = vld [vmem:[#allocation10 + $0x20] sm:$0xff] }
 0xd66   : > { %v4276_v41 = vld [vmem:[#allocation10 + $0x1a8] sm:$0xff]  ;;  %v5317_v49 = vpack.c.bf16 %v4244_v37, %v4243_v6 }
 0xd67   : > { %5306 = vmatprep.subr.bf16.mxu0 %v5305_v48  ;;  %5276 = vmatpush1.bf16.msra.mxu1 %v5275_v51  ;;  %v4228_v48 = vld [vmem:[#allocation10 + $0x28] sm:$0xff]  ;;  %v5349_v50 = vpack.c.bf16 %v4276_v41, %v4275_v38  ;;  %v4259_v51 = vld [vmem:[#allocation10 + $0x120] sm:$0xff] }
 0xd68   : > { %5308 = vmatpush1.bf16.msra.mxu0 %v5307_v52  ;;  %5310 = vmatprep.subr.bf16.mxu1 %v5309_v16  ;;  %v4260_v52 = vld [vmem:[#allocation10 + $0x128] sm:$0xff] }
 0xd69   : > { %5342 = vmatprep.subr.bf16.mxu0 %v5341_v20  ;;  %v4262_v20 = vld [vmem:[#allocation10 + $0x138] sm:$0xff]  ;;  %v4284_v36 = vld [vmem:[#allocation10 + $0x1e8] sm:$0xff] }
 0xd97   : > { %v3882_v53 = vpop.xlane.xlu0 %3881 }
 0xd98   : > { %v3887_v54 = vmul.f32 0.0078125, %v3882_v53  ;;  %v4245_v53 = vld [vmem:[#allocation10 + $0xb0] sm:$0xff] }
 0xd9a   : > { %v6541_v55 = vsub.f32 %v6524_v9, %v3887_v54  ;;  %v4246_v54 = vld [vmem:[#allocation10 + $0xb8] sm:$0xff] }
 0xd9b   : > { %v3884_v56 = vpop.xlane.xlu0 %3883  ;;  %v5321_v13 = vpack.c.bf16 %v4246_v54, %v4245_v53 }
 0xd9c   : > { %v3888_v58 = vmul.f32 0.0078125, %v3884_v56  ;;  %v3895_v59 = vmul.f32 %v6541_v55, %v6541_v55  ;;  %v4277_v56 = vld [vmem:[#allocation10 + $0x1b0] sm:$0xff] }
 0xd9e   : > { %v6546_v15 = vsub.f32 %v6527_v12, %v3888_v58  ;;  %3901 = vadd.xlane.f32.xlu0 %v3895_v59  ;;  %v4278_v58 = vld [vmem:[#allocation10 + $0x1b8] sm:$0xff]  ;;  %v5319_v59 = vpack.c.bf16 %v4228_v48, %v4227_v47 }
 0xd9f   : > { %v5353_v16 = vpack.c.bf16 %v4278_v58, %v4277_v56 }
 0xda0   : > { %v3896_v60 = vmul.f32 %v6546_v15, %v6546_v15 }
 0xda2   : > { %3903 = vadd.xlane.f32.xlu1 %v3896_v60  ;;  %v5351_v60 = vpack.c.bf16 %v4260_v52, %v4259_v51 }
 0xdf1   : > { %v3900_v21 = vpop.xlane.xlu1 %3899 }
 0xdf2   : > { %v3906_v22 = vmul.f32 0.0078125, %v3900_v21  ;;  %v3898_v23 = vpop.xlane.xlu0 %3897  ;;  %v4247_v21 = vld [vmem:[#allocation10 + $0xc0] sm:$0xff] }
 0xdf3   : > { %v3905_v24 = vmul.f32 0.0078125, %v3898_v23  ;;  %v4279_v23 = vld [vmem:[#allocation10 + $0x1c0] sm:$0xff] }
 0xdf4   : > { %v3910_v25 = vadd.f32 1e-05, %v3906_v22  ;;  %v4248_v22 = vld [vmem:[#allocation10 + $0xc8] sm:$0xff] }
 0xdf5   : > { %v3909_v26 = vadd.f32 1e-05, %v3905_v24  ;;  %v4280_v24 = vld [vmem:[#allocation10 + $0x1c8] sm:$0xff] }
 0xdf6   : > { %5557 = vrsqrt.f32 %v3910_v25  ;;  %v5323_v25 = vpack.c.bf16 %v4230_v8, %v4229_v7  ;;  %v4268_v8 = vld [vmem:[#allocation10 + $0x168] sm:$0xff] }
 0xdf7   : > { %5559 = vrsqrt.f32 %v3909_v26  ;;  %v5355_v26 = vpack.c.bf16 %v4262_v20, %v4261_v18  ;;  %v4285_v18 = vld [vmem:[#allocation10 + $0x1f0] sm:$0xff]  ;;  %v4286_v20 = vld [vmem:[#allocation10 + $0x1f8] sm:$0xff] }
 0xe00   : > { %v5558_v30 = vpop.eup %5557 }
 0xe01   : > { %v5560_v14 = vpop.eup %5559  ;;  %v3918_v0 = vmul.f32 %v5558_v30, %v6531_v45  ;;  %v5345_v45 = vpack.c.bf16 %v4274_v11, %v4273_v40  ;;  %v4231_v30 = vld [vmem:[#allocation10 + $0x40] sm:$0xff]  ;;  %v5359_v40 = vpack.c.bf16 %v4264_v28, %v4263_v4  ;;  %v4233_v11 = vld [vmem:[#allocation10 + $0x50] sm:$0xff] }
 0xe02   : > { %v3917_v62 = vmul.f32 %v5560_v14, %v6534_v46  ;;  %v4232_v14 = vld [vmem:[#allocation10 + $0x48] sm:$0xff] }
 0xe03   : > { %v3929_v46 = vmul.f32 %v6553_v34, %v3918_v0  ;;  %v5357_v0 = vpack.c.bf16 %v4280_v24, %v4279_v23  ;;  %v5327_v33 = vpack.c.bf16 %v4232_v14, %v4231_v30  ;;  %v4270_v24 = vld [vmem:[#allocation10 + $0x178] sm:$0xff]  ;;  %v4019_v30 = vsub.s32 2, %v6204_v10  ;;  %v4007_v14 = vld [vmem:[%s6686_s11] sm:$0xf]  ;;  %s5717_s11 = scalar_lea.vmem %s5716_s29, 1024 }
 0xe04   : > { %v3928_v31 = vmul.f32 %v6553_v34, %v3917_v62  ;;  %v5325_v62 = vpack.c.bf16 %v4248_v22, %v4247_v21  ;;  %v4237_v21 = vld [vmem:[#allocation10 + $0x70] sm:$0xff]  ;;  %v4238_v22 = vld [vmem:[#allocation10 + $0x78] sm:$0xff]  ;;  %p5719_p2 = scmp.lt.s32.totalorder %s5717_s11, %s5711_s27 }
 0xe05   : > { %v3940_v42 = vadd.f32 %v6559_v27, %v3929_v46  ;;  %v5329_v46 = vpack.c.bf16 %v4250_v39, %v4249_v17  ;;  %v5339_v23 = vpack.c.bf16 %v4238_v22, %v4237_v21  ;;  %v4020_v28 = vrot.slane %v4007_v14, %v4019_v30 }
 0xe06   : > { %v3939_v61 = vadd.f32 %v6559_v27, %v3928_v31  ;;  %v4282_v31 = vld [vmem:[#allocation10 + $0x1d8] sm:$0xff]  ;;  %p5720_p1 = por %p5719_p2, %p5718_p12 }
 0xe08   : > { %4094 = vmatmul.mubr.f32.vlgmr.msra.gmra.mrb[48].mxu1 %v3939_v61  ;;  %4183 = vmatmul.mubr.f32.vlgmr.msra.gmra.mrb[32].mxu0 %v3939_v61  ;;  %v4234_v61 = vld [vmem:[#allocation10 + $0x58] sm:$0xff]  ;;  %p5721_p13 = pnand %p5720_p1, %p5714_p7 }
 0xe09   : > { %4099 = vmatprep.mubr.f32.mxu1 %v5798_v19  ;;  %4188 = vmatprep.mubr.f32.mxu0 %v5798_v19  ;;  %v5331_v3 = vpack.c.bf16 %v4234_v61, %v4233_v11 }
 0xe0a   : > { %5312 = vmatpush3.bf16.msra.mxu1 %v5311_v2  ;;  %5344 = vmatpush3.bf16.msra.mxu0 %v5343_v35  ;;  %v5361_v2 = vpack.c.bf16 %v4282_v31, %v4281_v29  ;;  %v4265_v35 = vld [vmem:[#allocation10 + $0x150] sm:$0xff] }
 0xe0b   : > { %5314 = vmatprep.subr.bf16.mxu1 %v5313_v5  ;;  %5346 = vmatprep.subr.bf16.mxu0 %v5345_v45  ;;  %v4252_v5 = vld [vmem:[#allocation10 + $0xe8] sm:$0xff]  ;;  %v4283_v45 = vld [vmem:[#allocation10 + $0x1e0] sm:$0xff]  ;;  %v5363_v6 = vpack.c.bf16 %v4266_v1, %v4265_v35 }
 0xe0c   : > { %4100 = vmatmul.mubr.f32.gmra.mrb[50].mxu1 %v3940_v42  ;;  %4189 = vmatmul.mubr.f32.gmra.mrb[34].mxu0 %v3940_v42  ;;  %v5333_v37 = vpack.c.bf16 %v4252_v5, %v4251_v63  ;;  %v5365_v38 = vpack.c.bf16 %v4284_v36, %v4283_v45 }
 0xe0d   : > { %4105 = vmatprep.mubr.f32.mxu1 %v5798_v19  ;;  %4194 = vmatprep.mubr.f32.mxu0 %v5798_v19 }
 0xe0e   : > { %5316 = vmatpush3.bf16.msra.mxu1 %v5315_v43  ;;  %5348 = vmatpush3.bf16.msra.mxu0 %v5347_v44 }
 0xe0f   : > { %5318 = vmatprep.subr.bf16.mxu1 %v5317_v49  ;;  %5350 = vmatprep.subr.bf16.mxu0 %v5349_v50 }
 0xe12   : > { %5320 = vmatpush3.bf16.msra.mxu1 %v5319_v59  ;;  %5352 = vmatpush3.bf16.msra.mxu0 %v5351_v60  ;;  %v4236_v59 = vld [vmem:[#allocation10 + $0x68] sm:$0xff]  ;;  %v4267_v60 = vld [vmem:[#allocation10 + $0x160] sm:$0xff] }
 0xe13   : > { %5322 = vmatprep.subr.bf16.mxu1 %v5321_v13  ;;  %5354 = vmatprep.subr.bf16.mxu0 %v5353_v16  ;;  %v5367_v13 = vpack.c.bf16 %v4268_v8, %v4267_v60  ;;  %v4254_v16 = vld [vmem:[#allocation10 + $0xf8] sm:$0xff] }
 0xe16   : > { %5324 = vmatpush3.bf16.msra.mxu1 %v5323_v25  ;;  %5356 = vmatpush3.bf16.msra.mxu0 %v5355_v26  ;;  %v4011_v26 = vsub.s32 0, %v6204_v10 }
 0xe17   : > { %5326 = vmatprep.subr.bf16.mxu1 %v5325_v62  ;;  %5358 = vmatprep.subr.bf16.mxu0 %v5357_v0  ;;  %v4015_v62 = vsub.s32 1, %v6204_v10  ;;  %v4023_v0 = vsub.s32 3, %v6204_v10 }
 0xe18   : > { %v4012_v4 = vrot.slane %v4007_v14, %v4011_v26 }
 0xe19   : > { %v4016_v17 = vrot.slane %v4007_v14, %v4015_v62  ;;  %v4024_v39 = vrot.slane %v4007_v14, %v4023_v0 }
 0xe1a   : > { %5328 = vmatpush3.bf16.msra.mxu1 %v5327_v33  ;;  %5360 = vmatpush3.bf16.msra.mxu0 %v5359_v40 }
 0xe1b   : > { %5330 = vmatprep.subr.bf16.mxu1 %v5329_v46  ;;  %5362 = vmatprep.subr.bf16.mxu0 %v5361_v2 }
 0xe1e   : > { %5332 = vmatpush3.bf16.msra.mxu1 %v5331_v3  ;;  %5364 = vmatpush3.bf16.msra.mxu0 %v5363_v6 }
 0xe1f   : > { %5334 = vmatprep.subr.bf16.mxu1 %v5333_v37  ;;  %5366 = vmatprep.subr.bf16.mxu0 %v5365_v38 }
 0xe22   : > { %5368 = vmatpush3.bf16.msra.mxu0 %v5367_v13 }
 0xe2b   : > { %v3902_v41 = vpop.xlane.xlu0 %3901 }
 0xe2c   : > { %v3907_v42 = vmul.f32 0.0078125, %v3902_v41 }
 0xe2e   : > { %v3911_v43 = vadd.f32 1e-05, %v3907_v42 }
 0xe2f   : > { %v3904_v44 = vpop.xlane.xlu1 %3903 }
 0xe30   : > { %5561 = vrsqrt.f32 %v3911_v43  ;;  %v3908_v47 = vmul.f32 0.0078125, %v3904_v44 }
 0xe32   : > { %v3912_v48 = vadd.f32 1e-05, %v3908_v47 }
 0xe34   : > { %5563 = vrsqrt.f32 %v3912_v48 }
 0xe3a   : > { %v5562_v49 = vpop.eup %5561 }
 0xe3b   : > { %v3919_v50 = vmul.f32 %v5562_v49, %v6541_v55  ;;  %v4235_v55 = vld [vmem:[#allocation10 + $0x60] sm:$0xff] }
 0xe3c   : > { %v5335_v7 = vpack.c.bf16 %v4236_v59, %v4235_v55 }
 0xe3d   : > { %v3930_v51 = vmul.f32 %v6553_v34, %v3919_v50 }
 0xe3e   : > { %v5564_v52 = vpop.eup %5563  ;;  %5336 = vmatpush3.bf16.msra.mxu1 %v5335_v7 }
 0xe3f   : > { %v3941_v53 = vadd.f32 %v6559_v27, %v3930_v51  ;;  %v3920_v54 = vmul.f32 %v5564_v52, %v6546_v15  ;;  %v4253_v15 = vld [vmem:[#allocation10 + $0xf0] sm:$0xff] }
 0xe41   : > { %4106 = vmatmul.mubr.f32.gmra.mrb[52].mxu1 %v3941_v53  ;;  %4195 = vmatmul.mubr.f32.gmra.mrb[36].mxu0 %v3941_v53  ;;  %v3931_v56 = vmul.f32 %v6553_v34, %v3920_v54  ;;  %v5337_v34 = vpack.c.bf16 %v4254_v16, %v4253_v15 }
 0xe42   : > { %4111 = vmatprep.mubr.f32.mxu1 %v5798_v19  ;;  %4200 = vmatprep.mubr.f32.mxu0 %v5798_v19  ;;  %v5369_v19 = vpack.c.bf16 %v4286_v20, %v4285_v18 }
 0xe43   : > { %v3942_v58 = vadd.f32 %v6559_v27, %v3931_v56  ;;  %v4269_v27 = vld [vmem:[#allocation10 + $0x170] sm:$0xff]  ;;  %5338 = vmatprep.subr.bf16.mxu1 %v5337_v34 }
 0xe44   : > { %v5371_v25 = vpack.c.bf16 %v4270_v24, %v4269_v27  ;;  %5370 = vmatprep.subr.bf16.mxu0 %v5369_v19  ;;  %5340 = vmatpush3.bf16.msra.mxu1 %v5339_v23 }
 0xe45   : > { %4112 = vmatmul.mubr.f32.gmra.mrb[54].mxu1 %v3942_v58  ;;  %4201 = vmatmul.mubr.f32.gmra.mrb[38].mxu0 %v3942_v58 }
 0xe46   : > { %5372 = vmatpush3.bf16.msra.mxu0 %v5371_v25  ;;  %v4683_v25 = vld [vmem:[%s6687_s3] ss:$0 sm:$0xff] }
 0xedb   : > { %v4095_v29 = vpop.f32.mrb[48].mxu1  ;;  %v4184_v31 = vpop.f32.mrb[32].mxu0 }
 0xedc   : > { %v4096_v33 = vadd.f32 %v4095_v29, %v4012_v4  ;;  %v4185_v40 = vadd.f32 %v4184_v31, %v4020_v28  ;;  %v4097_v11 = vpop.f32.mrb[49].mxu1  ;;  %v4186_v61 = vpop.f32.mrb[33].mxu0 }
 0xedd   : > { %v4098_v46 = vadd.f32 %v4097_v11, %v4016_v17  ;;  %v4187_v2 = vadd.f32 %v4186_v61, %v4024_v39 }
 0xede   : > { %v4207_v45 = vmax.f32 %v4096_v33, 0.0  ;;  %v4209_v36 = vmax.f32 %v4185_v40, 0.0 }
 0xedf   : > { %v4208_v35 = vmax.f32 %v4098_v46, 0.0  ;;  %v4210_v1 = vmax.f32 %v4187_v2, 0.0  ;;  %v4101_v63 = vpop.f32.mrb[50].mxu1  ;;  %v4190_v5 = vpop.f32.mrb[34].mxu0 }
 0xee0   : > { %v4102_v3 = vadd.f32 %v4101_v63, %v4012_v4  ;;  %v4191_v10 = vadd.f32 %v4190_v5, %v4020_v28  ;;  %v4103_v6 = vpop.f32.mrb[51].mxu1  ;;  %v4192_v37 = vpop.f32.mrb[35].mxu0 }
 0xee1   : > { %v4104_v38 = vadd.f32 %v4103_v6, %v4016_v17  ;;  %v4193_v41 = vadd.f32 %v4192_v37, %v4024_v39  ;;  %4358 = vmatprep.mubr.f32.mxu1 %v4208_v35  ;;  %4443 = vmatprep.mubr.f32.mxu0 %v4210_v1 }
 0xee2   : > { %4359 = vmatmul.mubr.f32.vlgmr.msra.gmra.mrb[56].mxu1 %v4207_v45  ;;  %4444 = vmatmul.mubr.f32.vlgmr.msra.gmra.mrb[40].mxu0 %v4209_v36  ;;  %v4211_v44 = vmax.f32 %v4102_v3, 0.0  ;;  %v4213_v47 = vmax.f32 %v4191_v10, 0.0 }
 0xee3   : > { %v4212_v42 = vmax.f32 %v4104_v38, 0.0  ;;  %v4214_v43 = vmax.f32 %v4193_v41, 0.0 }
 0xee5   : > { %4363 = vmatprep.mubr.f32.mxu1 %v4212_v42  ;;  %4448 = vmatprep.mubr.f32.mxu0 %v4214_v43 }
 0xee6   : > { %4364 = vmatmul.mubr.f32.gmra.mrb[58].mxu1 %v4211_v44  ;;  %4449 = vmatmul.mubr.f32.gmra.mrb[42].mxu0 %v4213_v47 }
 0xf14   : > { %v4107_v48 = vpop.f32.mrb[52].mxu1  ;;  %v4196_v49 = vpop.f32.mrb[36].mxu0 }
 0xf15   : > { %v4108_v50 = vadd.f32 %v4107_v48, %v4012_v4  ;;  %v4197_v51 = vadd.f32 %v4196_v49, %v4020_v28  ;;  %v4109_v52 = vpop.f32.mrb[53].mxu1  ;;  %v4198_v53 = vpop.f32.mrb[37].mxu0 }
 0xf16   : > { %v4110_v54 = vadd.f32 %v4109_v52, %v4016_v17  ;;  %v4199_v56 = vadd.f32 %v4198_v53, %v4024_v39 }
 0xf17   : > { %v4215_v7 = vmax.f32 %v4108_v50, 0.0  ;;  %v4217_v8 = vmax.f32 %v4197_v51, 0.0 }
 0xf18   : > { %v4216_v58 = vmax.f32 %v4110_v54, 0.0  ;;  %v4218_v55 = vmax.f32 %v4199_v56, 0.0  ;;  %v4113_v59 = vpop.f32.mrb[54].mxu1  ;;  %v4202_v60 = vpop.f32.mrb[38].mxu0 }
 0xf19   : > { %v4114_v13 = vadd.f32 %v4113_v59, %v4012_v4  ;;  %v4203_v15 = vadd.f32 %v4202_v60, %v4020_v28  ;;  %v4115_v16 = vpop.f32.mrb[55].mxu1  ;;  %v4204_v18 = vpop.f32.mrb[39].mxu0 }
 0xf1a   : > { %v4116_v34 = vadd.f32 %v4115_v16, %v4016_v17  ;;  %v4205_v20 = vadd.f32 %v4204_v18, %v4024_v39  ;;  %4368 = vmatprep.mubr.f32.mxu1 %v4216_v58  ;;  %4453 = vmatprep.mubr.f32.mxu0 %v4218_v55 }
 0xf1b   : > { %4369 = vmatmul.mubr.f32.gmra.mrb[60].mxu1 %v4215_v7  ;;  %4454 = vmatmul.mubr.f32.gmra.mrb[44].mxu0 %v4217_v8  ;;  %v4219_v19 = vmax.f32 %v4114_v13, 0.0  ;;  %v4221_v23 = vmax.f32 %v4203_v15, 0.0 }
 0xf1c   : > { %v4220_v21 = vmax.f32 %v4116_v34, 0.0  ;;  %v4222_v22 = vmax.f32 %v4205_v20, 0.0 }
 0xf1e   : > { %4373 = vmatprep.mubr.f32.mxu1 %v4220_v21  ;;  %4458 = vmatprep.mubr.f32.mxu0 %v4222_v22 }
 0xf1f   : > { %4374 = vmatmul.mubr.f32.gmra.mrb[62].mxu1 %v4219_v19  ;;  %4459 = vmatmul.mubr.f32.gmra.mrb[46].mxu0 %v4221_v23 }
 0xfb5   : > { %v4839_v27 = vpop.f32.mrb[56].mxu1  ;;  %v4883_v24 = vpop.f32.mrb[40].mxu0 }
 0xfb6   : > { %v4840_v26 = vpop.f32.mrb[57].mxu1  ;;  %v4884_v30 = vpop.f32.mrb[41].mxu0 }
 0xfb7   : > { %v4841_v14 = vadd.f32 %v4840_v26, %v4839_v27  ;;  %v4885_v62 = vadd.f32 %v4884_v30, %v4883_v24 }
 0xfb9   : > { %v4361_v0 = vadd.f32 %v4841_v14, %v4683_v25  ;;  %v4842_v4 = vpop.f32.mrb[58].mxu1  ;;  %v4886_v28 = vpop.f32.mrb[42].mxu0 }
 0xfba   : > { %v4843_v17 = vpop.f32.mrb[59].mxu1  ;;  %v4887_v39 = vpop.f32.mrb[43].mxu0 }
 0xfbb   : > { %v4446_v29 = vadd.f32 %v4885_v62, %v4361_v0  ;;  %v4844_v31 = vadd.f32 %v4843_v17, %v4842_v4  ;;  %v4888_v33 = vadd.f32 %v4887_v39, %v4886_v28 }
 0xfbd   : > { %v4464_v40 = vadd.f32 %v4446_v29, %v6518_v32  ;;  %v4366_v11 = vadd.f32 %v4844_v31, %v4683_v25 }
 0xfbf   : > { %4468 = vst [vmem:[%s489_s14] sm:$0xff] %v4464_v40  ;;  %v4451_v61 = vadd.f32 %v4888_v33, %v4366_v11 }
 0xfc1   : > { %v4465_v46 = vadd.f32 %v4451_v61, %v6516_v57 }
 0xfc3   : > { %4469 = vst [vmem:[%s489_s14 + $0x8] sm:$0xff] %v4465_v46 }
 0xfee   : > { %v4845_v2 = vpop.f32.mrb[60].mxu1  ;;  %v4889_v35 = vpop.f32.mrb[44].mxu0 }
 0xfef   : > { %v4846_v1 = vpop.f32.mrb[61].mxu1  ;;  %v4890_v63 = vpop.f32.mrb[45].mxu0 }
 0xff0   : > { %v4847_v5 = vadd.f32 %v4846_v1, %v4845_v2  ;;  %v4891_v45 = vadd.f32 %v4890_v63, %v4889_v35 }
 0xff2   : > { %v4371_v36 = vadd.f32 %v4847_v5, %v4683_v25  ;;  %v4848_v3 = vpop.f32.mrb[62].mxu1  ;;  %v4892_v10 = vpop.f32.mrb[46].mxu0 }
 0xff3   : > { %v4849_v32 = vpop.f32.mrb[63].mxu1  ;;  %v4893_v6 = vpop.f32.mrb[47].mxu0 }
 0xff4   : > { %v4456_v37 = vadd.f32 %v4891_v45, %v4371_v36  ;;  %v4850_v38 = vadd.f32 %v4849_v32, %v4848_v3  ;;  %v4894_v41 = vadd.f32 %v4893_v6, %v4892_v10 }
 0xff6   : > { %v4466_v57 = vadd.f32 %v4456_v37, %v6524_v9  ;;  %v4376_v42 = vadd.f32 %v4850_v38, %v4683_v25 }
 0xff8   : > { %4470 = vst [vmem:[%s489_s14 + $0x10] sm:$0xff] %v4466_v57  ;;  %v4461_v43 = vadd.f32 %v4894_v41, %v4376_v42 }
 0xffa   : > { %v4467_v44 = vadd.f32 %v4461_v43, %v6527_v12 }
 0xffc   : > { %4471 = vst [vmem:[%s489_s14 + $0x18] sm:$0xff] %v4467_v44 }
 0xffd   : > { %5724 = shalt.err (!%p5721_p13)
}
 0xffe   : > { %s5725_s9 = scalar_lea.hbm %s6599_s28, 512  ;;  %s5729_s14 = scalar_lea.hbm %s6688_s13, 1024 }
 0xfff   : > { %p5726_p9 = scmp.ne.s32.totalorder %s6599_s28, %s5725_s9  ;;  %p5730_p4 = scmp.lt.u32.totalorder %s6599_s28, %s6688_s13 }
0x1000   : > { %p5731_p8 = scmp.lt.u32.totalorder %s5729_s14, %s5725_s9  ;;  %p5733_p3 = scmp.lt.u32.totalorder %s5725_s9, %s6599_s28 }
0x1001   : > { %p5727_p0 = pnand %p5726_p9, %p6033_p10 }
0x1002   : > { %p5732_p6 = por %p5731_p8, %p5730_p4 }
0x1003   : > { %p5728_p11 = pneg %p5727_p0 }
0x1004   : > { %p5734_p5 = por %p5733_p3, %p5732_p6 }
0x1006   : > { %p5735_p7 = pnand %p5734_p5, %p5728_p11 }
0x1008   : > { %5738 = shalt.err (!%p5735_p7)
}
0x1009   : > { %s5804_s18 = smov 128   ;;  %s5805_s27 = smov 8  }
0x100a   : > { %5403 = dma.vmem_to_hbm [thread:$0]  (%p6033_p10), %s6594_s17, 512, %s6599_s28, %s4473_s12, %s5804_s18, %s5804_s18, %s5805_s27  }
0x100b PF: > { %s6689_s25 = sld [smem:[#allocation16_spill]]  ;;  %s6690_s29 = sld [smem:[#allocation17_spill]] }
0x100c   : > { %p6692_p2 = scmp.ge.s32.totalorder %s5785_s24, 2 }
0x1011   : > { %s4501_s11 = sand.u32 1, %s6689_s25   ;;  %p6691_p12 = scmp.ne.s32.totalorder %s6690_s29, 0 }
0x1012   : > { %s4502_s9 = scalar_lea.sflag [#allocation4], %s4501_s11 }
0x1013   : > { %p5423_p1 = pnand %p6692_p2, %p6691_p12 }
0x1015   : > { %5768 = dma.done.wait (!%p5423_p1), %s4502_s9, 512  }
0x1016   : > { %5770 = vsyncadd (!%p5423_p1), %s4502_s9, 4294966784  ;;  %p27_p13 = scmp.ge.s32.totalorder %s6023_s30, 4   ;;  %s6693_s21 = smov %s5777_s22 }
0x1017   : > { %s6694_s22 = smov %s5781_s23  ;;  %s6695_s23 = smov %s6039_s20 }
0x1018   : > { %s6696_s24 = smov %s6023_s30  ;;  %29 = sbr.rel (!%p27_p13) target bundleno = 12 (0xc), region = 129 }
0x101f   :  { %4507 = vsyncpa [#allocation3], 1 }
0x1020   :  { %4509 = vsyncpa [#allocation3 + $0x1], 1 }
0x1021   :  { %4510 = vsyncpa [#allocation6], 1 }
0x1022   :  { %4511 = vsyncpa [#allocation9], 1 }
0x1023   :  { %4512 = vsyncpa [#allocation4], 1 }
0x1024   :  { %4514 = vsyncpa [#allocation4 + $0x1], 1 }

</bundles_post_ra>
